<compile_context>
chip_gen: v7x
topology: tpu7x:2x2x1
jax: 0.10.0
libtpu: 0.0.40
codegen_flags: <defaults>
</compile_context>

<pallas_src>
import functools

import jax
import jax.numpy as jnp
from jax.experimental import pallas as pl
from jax.experimental.pallas import tpu as pltpu

NEG_SLOPE = 0.01   # nn.LeakyReLU default
BN_EPS = 1e-5      # nn.BatchNorm1d default
_LANE = 128
_SUBLANE = 8


def _round_up(x, m):
    return (x + m - 1) // m * m


# --------------------------------------------------------------------------- kernel


def classifier_kernel(inv_ref, feat_ref,
                      w1_ref, b1_ref,
                      w2_ref, b2_ref,
                      w3_ref, b3_ref,
                      w4_ref, b4_ref,
                      out_ref):
    """One batch tile: masked global average pool over N + 4-layer MLP head."""
    # MaskedGlobalAvgPool1d: reduce the native point axis (lanes) in f32, then scale
    # by the precomputed exact reciprocal of the valid-point count.  No tile-sized
    # f32 temporary is materialized.
    pooled = jnp.sum(feat_ref[...], axis=-1, dtype=jnp.float32)   # (tb, C), C on lanes
    pooled = pooled * inv_ref[...]                                # (tb, 1) broadcast

    def lin(h, w_ref, b_ref):
        # bf16 x bf16 MXU matmul, f32 accumulate, f32 bias (BN already folded in).
        return jnp.dot(h.astype(jnp.bfloat16), w_ref[...],
                       preferred_element_type=jnp.float32) + b_ref[...]

    def lrelu(z):
        return jnp.where(z > 0, z, NEG_SLOPE * z)

    h = lrelu(lin(pooled, w1_ref, b1_ref))   # (tb, H1p)   Linear+BN+LeakyReLU (+Dropout=id)
    h = lrelu(lin(h, w2_ref, b2_ref))        # (tb, H2p)
    h = lrelu(lin(h, w3_ref, b3_ref))        # (tb, H3p)
    out_ref[...] = lin(h, w4_ref, b4_ref)    # (tb, Kp) lane-dense store


# ------------------------------------------------------------------- param folding


def fold_classifier_params(params):
    """Fold Linear + eval-mode BatchNorm1d into bf16 matmul weights + f32 biases,
    zero-padded so every output dim is a multiple of 128.  Call ONCE, outside the
    per-step forward (hoisted out of the jitted per-call path)."""
    c_in = params["w1"].shape[1]
    h1p = _round_up(params["w1"].shape[0], _LANE)
    h2p = _round_up(params["w2"].shape[0], _LANE)
    h3p = _round_up(params["w3"].shape[0], _LANE)
    kp = _round_up(params["w4"].shape[0], _LANE)

    def fold(w, b, g, be, m, v, in_pad, out_pad):
        s = g / jnp.sqrt(v + BN_EPS)                              # (out,)
        w_f = (w.T * s[None, :]).astype(jnp.float32)              # (in, out)
        b_f = (b * s + (be - m * s)).astype(jnp.float32)          # (out,)
        w_f = jnp.pad(w_f, ((0, in_pad - w_f.shape[0]), (0, out_pad - w_f.shape[1])))
        b_f = jnp.pad(b_f, (0, out_pad - b_f.shape[0]))[None, :]  # (1, out_pad)
        return w_f.astype(jnp.bfloat16), b_f

    w1, b1 = fold(params["w1"], params["b1"], params["g1"], params["be1"],
                  params["m1"], params["v1"], c_in, h1p)
    w2, b2 = fold(params["w2"], params["b2"], params["g2"], params["be2"],
                  params["m2"], params["v2"], h1p, h2p)
    w3, b3 = fold(params["w3"], params["b3"], params["g3"], params["be3"],
                  params["m3"], params["v3"], h2p, h3p)
    n_cls = params["w4"].shape[0]
    w4 = jnp.pad(params["w4"].T.astype(jnp.float32),
                 ((0, h3p - params["w4"].shape[1]), (0, kp - n_cls))).astype(jnp.bfloat16)
    b4 = jnp.pad(params["b4"].astype(jnp.float32), (0, kp - n_cls))[None, :]
    return dict(w1=w1, b1=b1, w2=w2, b2=b2, w3=w3, b3=b3, w4=w4, b4=b4)


# ----------------------------------------------------------------------- tiling cfg


def _vmem_capacity_bytes():
    try:
        return int(pltpu.get_tpu_info().vmem_capacity_bytes)
    except Exception:
        return 64 << 20   # conservative (v7x per-core VMEM); safe on all generations


def _choose_batch_tile(batch, c, n, itemsize, vmem_cap):
    """Largest multiple-of-8 batch tile whose double-buffered feature tile stays well
    inside physical VMEM, capped so the grid has >= 2 steps when B allows (v7x TCs)."""
    per_buffer_budget = max(2 << 20, vmem_cap // 8)   # 2 buffers <= vmem/4, ample headroom
    rows = per_buffer_budget // max(1, c * n * itemsize)
    rows = max(_SUBLANE, (rows // _SUBLANE) * _SUBLANE)
    rows = min(rows, 1024)
    if batch >= 2 * _SUBLANE:
        # guarantee >= 2 grid steps so megacore ("parallel") has work for both cores
        rows = min(rows, _round_up(pl.cdiv(batch, 2), _SUBLANE))
    rows = min(rows, _round_up(batch, _SUBLANE))
    return rows


def _resident_spec(shape):
    """Constant-index (VMEM-resident) weight/bias spec, single-buffered when supported."""
    index_map = lambda i, _nd=len(shape): (0,) * _nd
    try:
        return pl.BlockSpec(shape, index_map, pipeline_mode=pl.Buffered(1))
    except TypeError:   # older jax without pipeline_mode: default double-buffering
        return pl.BlockSpec(shape, index_map)


# -------------------------------------------------------------------------- forward


@functools.partial(jax.jit, static_argnames=("num_classes",))
def classifier_resnet_forward(mask, features, folded, *, num_classes):
    """mask: (B, N); features: (B, C, N) (native PyTorch NCL layout, streamed as-is).
    `folded` comes from fold_classifier_params(). Returns (B, num_classes) f32."""
    B, C, N = features.shape
    kp = folded["b4"].shape[1]

    # Exact per-row reciprocal of the valid-point count (tiny (B,1) tensor) so the
    # kernel neither streams the full mask nor uses an approximate reciprocal.
    # NOTE: an all-zero mask row yields inf/NaN, same as the PyTorch module.
    inv_counts = 1.0 / mask.astype(jnp.float32).sum(-1, keepdims=True)     # (B, 1)

    vmem_cap = _vmem_capacity_bytes()
    tb = _choose_batch_tile(B, C, N, features.dtype.itemsize, vmem_cap)
    grid = (pl.cdiv(B, tb),)
    vmem_limit = max(32 << 20, min(vmem_cap * 3 // 4, 96 << 20))

    out = pl.pallas_call(
        classifier_kernel,
        out_shape=jax.ShapeDtypeStruct((B, kp), jnp.float32),
        grid=grid,
        in_specs=[
            pl.BlockSpec((tb, 1), lambda i: (i, 0)),          # reciprocal counts
            pl.BlockSpec((tb, C, N), lambda i: (i, 0, 0)),    # native-layout feature tile
            _resident_spec(folded["w1"].shape), _resident_spec(folded["b1"].shape),
            _resident_spec(folded["w2"].shape), _resident_spec(folded["b2"].shape),
            _resident_spec(folded["w3"].shape), _resident_spec(folded["b3"].shape),
            _resident_spec(folded["w4"].shape), _resident_spec(folded["b4"].shape),
        ],
        out_specs=pl.BlockSpec((tb, kp), lambda i: (i, 0)),
        compiler_params=pltpu.CompilerParams(
            dimension_semantics=("parallel",),     # megacore-shard the batch axis
            vmem_limit_bytes=vmem_limit,           # ~96 MiB on v5e/v6e, ~48 MiB on v7x
        ),
    )(inv_counts, features,
      folded["w1"], folded["b1"], folded["w2"], folded["b2"],
      folded["w3"], folded["b3"], folded["w4"], folded["b4"])

    return out[:, :num_classes]


# ------------------------------------------------------------------ reference & init


def _reference_forward(mask, features, params):
    """Pure-JAX f32 reference mirroring the PyTorch eval-mode forward."""
    pooled = features.sum(-1) / mask.sum(-1)[:, None]

    def block(h, w, b, g, be, m, v):
        z = h @ w.T + b
        z = (z - m) / jnp.sqrt(v + BN_EPS) * g + be
        return jnp.where(z > 0, z, NEG_SLOPE * z)

    h = block(pooled, params["w1"], params["b1"], params["g1"],
              params["be1"], params["m1"], params["v1"])
    h = block(h, params["w2"], params["b2"], params["g2"],
              params["be2"], params["m2"], params["v2"])
    h = block(h, params["w3"], params["b3"], params["g3"],
              params["be3"], params["m3"], params["v3"])
    return h @ params["w4"].T + params["b4"]


def _init_params(key, width, num_classes):
    dims = [16 * width, 8 * width, 4 * width, 2 * width, num_classes]
    params = {}
    ks = jax.random.split(key, 16)
    ki = 0
    for i in range(3):
        d_in, d_out = dims[i], dims[i + 1]
        params[f"w{i+1}"] = 0.05 * jax.random.normal(ks[ki], (d_out, d_in), jnp.float32); ki += 1
        params[f"b{i+1}"] = 0.05 * jax.random.normal(ks[ki], (d_out,), jnp.float32); ki += 1
        params[f"g{i+1}"] = 0.5 + jax.random.uniform(ks[ki], (d_out,), jnp.float32); ki += 1
        params[f"be{i+1}"] = 0.1 * jax.random.normal(ks[ki], (d_out,), jnp.float32); ki += 1
        params[f"m{i+1}"] = 0.1 * jax.random.normal(ks[ki], (d_out,), jnp.float32)
        params[f"v{i+1}"] = 0.5 + jax.random.uniform(ks[ki], (d_out,), jnp.float32)
    params["w4"] = 0.05 * jax.random.normal(ks[ki], (dims[4], dims[3]), jnp.float32); ki += 1
    params["b4"] = 0.05 * jax.random.normal(ks[ki], (dims[4],), jnp.float32)
    return params


if __name__ == "__main__":
    # Small shapes consistent with the module: width=8 -> 16*width = 128 channels.
    B, width, num_classes, N = 4, 8, 10, 16
    C = 16 * width

    key = jax.random.PRNGKey(0)
    k_feat, k_mask, k_par = jax.random.split(key, 3)

    features = jax.random.normal(k_feat, (B, C, N), jnp.float32)            # res5_features (B, C, N)
    mask = (jax.random.uniform(k_mask, (B, N)) > 0.3).astype(jnp.float32)   # res5_mask (B, N)
    mask = mask.at[:, 0].set(1.0)  # guarantee at least one valid point per batch row

    params = _init_params(k_par, width, num_classes)
    folded = fold_classifier_params(params)   # BN folding / padding hoisted out of the forward

    logits = classifier_resnet_forward(mask, features, folded, num_classes=num_classes)
    jax.block_until_ready(logits)

    ref = _reference_forward(mask, features, params)
    assert logits.shape == (B, num_classes)
    # bf16 MXU weights/activations (f32 accumulate) => slightly looser tolerance than pure f32.
    assert jnp.allclose(logits, ref, rtol=2e-2, atol=2e-2), "mismatch vs pure-JAX reference"

    print("KERNEL_OK")
</pallas_src>

<mosaic_0001>
module attributes {stable_mosaic.version = 11 : i64} {
  func.func @classifier_kernel(%arg0: i32, %arg1: memref<8x1xf32, #tpu.memory_space<vmem>>, %arg2: memref<8x128x16xf32, #tpu.memory_space<vmem>>, %arg3: memref<128x128xbf16, #tpu.memory_space<vmem>>, %arg4: memref<1x128xf32, #tpu.memory_space<vmem>>, %arg5: memref<128x128xbf16, #tpu.memory_space<vmem>>, %arg6: memref<1x128xf32, #tpu.memory_space<vmem>>, %arg7: memref<128x128xbf16, #tpu.memory_space<vmem>>, %arg8: memref<1x128xf32, #tpu.memory_space<vmem>>, %arg9: memref<128x128xbf16, #tpu.memory_space<vmem>>, %arg10: memref<1x128xf32, #tpu.memory_space<vmem>>, %arg11: memref<8x128xf32, #tpu.memory_space<vmem>>) attributes {dimension_semantics = [#tpu.dimension_semantics<parallel>], iteration_bounds = array<i64: 1>, scalar_prefetch = 0 : i64, scratch_operands = 0 : i64, tpu.core_type = #tpu.core_type<tc>, window_params = [{transform_indices = @transform_0, window_bounds = array<i64: 8, 1>}, {transform_indices = @transform_1, window_bounds = array<i64: 8, 128, 16>}, {pipeline_mode = #tpu.pipeline_mode<synchronous>, transform_indices = @transform_2, window_bounds = array<i64: 128, 128>}, {pipeline_mode = #tpu.pipeline_mode<synchronous>, transform_indices = @transform_3, window_bounds = array<i64: 1, 128>}, {pipeline_mode = #tpu.pipeline_mode<synchronous>, transform_indices = @transform_4, window_bounds = array<i64: 128, 128>}, {pipeline_mode = #tpu.pipeline_mode<synchronous>, transform_indices = @transform_5, window_bounds = array<i64: 1, 128>}, {pipeline_mode = #tpu.pipeline_mode<synchronous>, transform_indices = @transform_6, window_bounds = array<i64: 128, 128>}, {pipeline_mode = #tpu.pipeline_mode<synchronous>, transform_indices = @transform_7, window_bounds = array<i64: 1, 128>}, {pipeline_mode = #tpu.pipeline_mode<synchronous>, transform_indices = @transform_8, window_bounds = array<i64: 128, 128>}, {pipeline_mode = #tpu.pipeline_mode<synchronous>, transform_indices = @transform_9, window_bounds = array<i64: 1, 128>}, {transform_indices = @transform_10, window_bounds = array<i64: 8, 128>}]} {
    %c0 = arith.constant 0 : index
    %c0_0 = arith.constant 0 : index
    %c0_1 = arith.constant 0 : index
    %0 = vector.load %arg2[%c0, %c0_0, %c0_1] : memref<8x128x16xf32, #tpu.memory_space<vmem>>, vector<8x128x16xf32>
    %cst = arith.constant dense<0.000000e+00> : vector<8x128xf32>
    %1 = vector.multi_reduction <add>, %0, %cst [2] : vector<8x128x16xf32> to vector<8x128xf32>
    %c0_2 = arith.constant 0 : index
    %c0_3 = arith.constant 0 : index
    %2 = vector.load %arg1[%c0_2, %c0_3] : memref<8x1xf32, #tpu.memory_space<vmem>>, vector<8x1xf32>
    %3 = vector.broadcast %2 : vector<8x1xf32> to vector<8x128xf32>
    %4 = arith.mulf %1, %3 : vector<8x128xf32>
    %5 = arith.truncf %4 : vector<8x128xf32> to vector<8x128xbf16>
    %c0_4 = arith.constant 0 : index
    %c0_5 = arith.constant 0 : index
    %6 = vector.load %arg3[%c0_4, %c0_5] : memref<128x128xbf16, #tpu.memory_space<vmem>>, vector<128x128xbf16>
    %cst_6 = arith.constant dense<0.000000e+00> : vector<8x128xf32>
    %7 = tpu.matmul %5, %6, %cst_6 {dimension_numbers = #tpu.dot_dimension_numbers<[1], [0], [0], [1], [0, 0, 1, 1], [], []>} : vector<8x128xbf16>, vector<128x128xbf16>, vector<8x128xf32> -> vector<8x128xf32>
    %c0_7 = arith.constant 0 : index
    %c0_8 = arith.constant 0 : index
    %8 = vector.load %arg4[%c0_7, %c0_8] : memref<1x128xf32, #tpu.memory_space<vmem>>, vector<1x128xf32>
    %9 = vector.broadcast %8 : vector<1x128xf32> to vector<8x128xf32>
    %10 = arith.addf %7, %9 : vector<8x128xf32>
    %cst_9 = arith.constant 0.000000e+00 : f32
    %11 = vector.broadcast %cst_9 : f32 to vector<8x128xf32>
    %12 = arith.cmpf ogt, %10, %11 : vector<8x128xf32>
    %cst_10 = arith.constant 0.00999999977 : f32
    %13 = vector.broadcast %cst_10 : f32 to vector<8x128xf32>
    %14 = arith.mulf %13, %10 : vector<8x128xf32>
    %15 = arith.select %12, %10, %14 : vector<8x128xi1>, vector<8x128xf32>
    %16 = arith.truncf %15 : vector<8x128xf32> to vector<8x128xbf16>
    %c0_11 = arith.constant 0 : index
    %c0_12 = arith.constant 0 : index
    %17 = vector.load %arg5[%c0_11, %c0_12] : memref<128x128xbf16, #tpu.memory_space<vmem>>, vector<128x128xbf16>
    %cst_13 = arith.constant dense<0.000000e+00> : vector<8x128xf32>
    %18 = tpu.matmul %16, %17, %cst_13 {dimension_numbers = #tpu.dot_dimension_numbers<[1], [0], [0], [1], [0, 0, 1, 1], [], []>} : vector<8x128xbf16>, vector<128x128xbf16>, vector<8x128xf32> -> vector<8x128xf32>
    %c0_14 = arith.constant 0 : index
    %c0_15 = arith.constant 0 : index
    %19 = vector.load %arg6[%c0_14, %c0_15] : memref<1x128xf32, #tpu.memory_space<vmem>>, vector<1x128xf32>
    %20 = vector.broadcast %19 : vector<1x128xf32> to vector<8x128xf32>
    %21 = arith.addf %18, %20 : vector<8x128xf32>
    %cst_16 = arith.constant 0.000000e+00 : f32
    %22 = vector.broadcast %cst_16 : f32 to vector<8x128xf32>
    %23 = arith.cmpf ogt, %21, %22 : vector<8x128xf32>
    %cst_17 = arith.constant 0.00999999977 : f32
    %24 = vector.broadcast %cst_17 : f32 to vector<8x128xf32>
    %25 = arith.mulf %24, %21 : vector<8x128xf32>
    %26 = arith.select %23, %21, %25 : vector<8x128xi1>, vector<8x128xf32>
    %27 = arith.truncf %26 : vector<8x128xf32> to vector<8x128xbf16>
    %c0_18 = arith.constant 0 : index
    %c0_19 = arith.constant 0 : index
    %28 = vector.load %arg7[%c0_18, %c0_19] : memref<128x128xbf16, #tpu.memory_space<vmem>>, vector<128x128xbf16>
    %cst_20 = arith.constant dense<0.000000e+00> : vector<8x128xf32>
    %29 = tpu.matmul %27, %28, %cst_20 {dimension_numbers = #tpu.dot_dimension_numbers<[1], [0], [0], [1], [0, 0, 1, 1], [], []>} : vector<8x128xbf16>, vector<128x128xbf16>, vector<8x128xf32> -> vector<8x128xf32>
    %c0_21 = arith.constant 0 : index
    %c0_22 = arith.constant 0 : index
    %30 = vector.load %arg8[%c0_21, %c0_22] : memref<1x128xf32, #tpu.memory_space<vmem>>, vector<1x128xf32>
    %31 = vector.broadcast %30 : vector<1x128xf32> to vector<8x128xf32>
    %32 = arith.addf %29, %31 : vector<8x128xf32>
    %cst_23 = arith.constant 0.000000e+00 : f32
    %33 = vector.broadcast %cst_23 : f32 to vector<8x128xf32>
    %34 = arith.cmpf ogt, %32, %33 : vector<8x128xf32>
    %cst_24 = arith.constant 0.00999999977 : f32
    %35 = vector.broadcast %cst_24 : f32 to vector<8x128xf32>
    %36 = arith.mulf %35, %32 : vector<8x128xf32>
    %37 = arith.select %34, %32, %36 : vector<8x128xi1>, vector<8x128xf32>
    %38 = arith.truncf %37 : vector<8x128xf32> to vector<8x128xbf16>
    %c0_25 = arith.constant 0 : index
    %c0_26 = arith.constant 0 : index
    %39 = vector.load %arg9[%c0_25, %c0_26] : memref<128x128xbf16, #tpu.memory_space<vmem>>, vector<128x128xbf16>
    %cst_27 = arith.constant dense<0.000000e+00> : vector<8x128xf32>
    %40 = tpu.matmul %38, %39, %cst_27 {dimension_numbers = #tpu.dot_dimension_numbers<[1], [0], [0], [1], [0, 0, 1, 1], [], []>} : vector<8x128xbf16>, vector<128x128xbf16>, vector<8x128xf32> -> vector<8x128xf32>
    %c0_28 = arith.constant 0 : index
    %c0_29 = arith.constant 0 : index
    %41 = vector.load %arg10[%c0_28, %c0_29] : memref<1x128xf32, #tpu.memory_space<vmem>>, vector<1x128xf32>
    %42 = vector.broadcast %41 : vector<1x128xf32> to vector<8x128xf32>
    %43 = arith.addf %40, %42 : vector<8x128xf32>
    %c0_30 = arith.constant 0 : index
    %c0_31 = arith.constant 0 : index
    %44 = vector.load %arg11[%c0_30, %c0_31] : memref<8x128xf32, #tpu.memory_space<vmem>>, vector<8x128xf32>
    tpu.vector_store %arg11[%c0_30, %c0_31], %43 {strides = array<i32>} : memref<8x128xf32, #tpu.memory_space<vmem>>, vector<8x128xf32>,
    return
  }
  func.func @transform_0(%arg0: i32) -> (i32, i32) {
    %c0_i32 = arith.constant 0 : i32
    %c0_i32_0 = arith.constant 0 : i32
    return %arg0, %c0_i32 : i32, i32
  }
  func.func @transform_1(%arg0: i32) -> (i32, i32, i32) {
    %c0_i32 = arith.constant 0 : i32
    %c0_i32_0 = arith.constant 0 : i32
    %c0_i32_1 = arith.constant 0 : i32
    return %arg0, %c0_i32, %c0_i32_0 : i32, i32, i32
  }
  func.func @transform_2(%arg0: i32) -> (i32, i32) {
    %c0_i32 = arith.constant 0 : i32
    %c0_i32_0 = arith.constant 0 : i32
    %c0_i32_1 = arith.constant 0 : i32
    return %c0_i32, %c0_i32_0 : i32, i32
  }
  func.func @transform_3(%arg0: i32) -> (i32, i32) {
    %c0_i32 = arith.constant 0 : i32
    %c0_i32_0 = arith.constant 0 : i32
    %c0_i32_1 = arith.constant 0 : i32
    return %c0_i32, %c0_i32_0 : i32, i32
  }
  func.func @transform_4(%arg0: i32) -> (i32, i32) {
    %c0_i32 = arith.constant 0 : i32
    %c0_i32_0 = arith.constant 0 : i32
    %c0_i32_1 = arith.constant 0 : i32
    return %c0_i32, %c0_i32_0 : i32, i32
  }
  func.func @transform_5(%arg0: i32) -> (i32, i32) {
    %c0_i32 = arith.constant 0 : i32
    %c0_i32_0 = arith.constant 0 : i32
    %c0_i32_1 = arith.constant 0 : i32
    return %c0_i32, %c0_i32_0 : i32, i32
  }
  func.func @transform_6(%arg0: i32) -> (i32, i32) {
    %c0_i32 = arith.constant 0 : i32
    %c0_i32_0 = arith.constant 0 : i32
    %c0_i32_1 = arith.constant 0 : i32
    return %c0_i32, %c0_i32_0 : i32, i32
  }
  func.func @transform_7(%arg0: i32) -> (i32, i32) {
    %c0_i32 = arith.constant 0 : i32
    %c0_i32_0 = arith.constant 0 : i32
    %c0_i32_1 = arith.constant 0 : i32
    return %c0_i32, %c0_i32_0 : i32, i32
  }
  func.func @transform_8(%arg0: i32) -> (i32, i32) {
    %c0_i32 = arith.constant 0 : i32
    %c0_i32_0 = arith.constant 0 : i32
    %c0_i32_1 = arith.constant 0 : i32
    return %c0_i32, %c0_i32_0 : i32, i32
  }
  func.func @transform_9(%arg0: i32) -> (i32, i32) {
    %c0_i32 = arith.constant 0 : i32
    %c0_i32_0 = arith.constant 0 : i32
    %c0_i32_1 = arith.constant 0 : i32
    return %c0_i32, %c0_i32_0 : i32, i32
  }
  func.func @transform_10(%arg0: i32) -> (i32, i32) {
    %c0_i32 = arith.constant 0 : i32
    %c0_i32_0 = arith.constant 0 : i32
    return %arg0, %c0_i32 : i32, i32
  }
}

</mosaic_0001>

<bundles_post_ra>
// kernel: classifier_resnet_forward.1
= control target key start
LH: loop header
LB: loop body
LE: loop exit
PB: predicated region body
PF: predicated region fallthrough
CT: control target
= control target key end

     0   :  { %vm165_vm0 = vcmask 130048   ;;  %s4583_s0 = inlined_call_operand.vmem [shape: f32[4,1], index: 0, kind: input, shape index: {}]   ;;  %s4584_s1 = inlined_call_operand.vmem [shape: f32[4,128,16], index: 1, kind: input, shape index: {}]   ;;  %s4585_s2 = inlined_call_operand.vmem [shape: bf16[128,128], index: 2, kind: input, shape index: {}]   ;;  %s4586_s3 = inlined_call_operand.vmem [shape: f32[1,128], index: 3, kind: input, shape index: {}]   ;;  %s4587_s4 = inlined_call_operand.vmem [shape: bf16[128,128], index: 4, kind: input, shape index: {}]   ;;  %s4588_s5 = inlined_call_operand.vmem [shape: f32[1,128], index: 5, kind: input, shape index: {}]   ;;  %s4589_s6 = inlined_call_operand.vmem [shape: bf16[128,128], index: 6, kind: input, shape index: {}]   ;;  %s4590_s7 = inlined_call_operand.vmem [shape: f32[1,128], index: 7, kind: input, shape index: {}]   ;;  %s4591_s8 = inlined_call_operand.vmem [shape: bf16[128,128], index: 8, kind: input, shape index: {}]   ;;  %s4592_s9 = inlined_call_operand.vmem [shape: f32[1,128], index: 9, kind: input, shape index: {}]   ;;  %s4593_s10 = inlined_call_operand.hbm [shape: f32[4,128], index: 10, kind: output, shape index: {}]  }
   0x1   :  { %v53_v0 = vld [vmem:[%s4584_s1 + $0x80] sm:$0xff]  ;;  %v54_v2 = vld [vmem:[%s4584_s1 + $0x88] sm:$0xff]  ;;  %v40_v8 = vld [vmem:[%s4584_s1 + $0x18] sm:$0xff] }
   0x2   :  { %v37_v1 = vld [vmem:[%s4584_s1] sm:$0xff]  ;;  %v214_v3 = vsel %vm165_vm0, %v53_v0, 0.0  ;;  %v38_v5 = vld [vmem:[%s4584_s1 + $0x8] sm:$0xff]  ;;  %v217_v6 = vsel %vm165_vm0, %v54_v2, 0.0  ;;  %v39_v9 = vld [vmem:[%s4584_s1 + $0x10] sm:$0xff]  ;;  %v175_v10 = vsel %vm165_vm0, %v40_v8, 0.0 }
   0x3   :  { %v166_v4 = vsel %vm165_vm0, %v37_v1, 0.0  ;;  %215 = vadd.xlane.f32.xlu1 %v214_v3  ;;  %v169_v7 = vsel %vm165_vm0, %v38_v5, 0.0  ;;  %v172_v11 = vsel %vm165_vm0, %v39_v9, 0.0  ;;  %v56_v12 = vld [vmem:[%s4584_s1 + $0x98] sm:$0xff]  ;;  %v55_v13 = vld [vmem:[%s4584_s1 + $0x90] sm:$0xff]  ;;  %v70_v16 = vld [vmem:[%s4584_s1 + $0x108] sm:$0xff] }
   0x4   :  { %167 = vadd.xlane.f32.xlu0 %v166_v4  ;;  %v223_v14 = vsel %vm165_vm0, %v56_v12, 0.0  ;;  %v220_v15 = vsel %vm165_vm0, %v55_v13, 0.0  ;;  %v69_v17 = vld [vmem:[%s4584_s1 + $0x100] sm:$0xff]  ;;  %v265_v18 = vsel %vm165_vm0, %v70_v16, 0.0  ;;  %v72_v20 = vld [vmem:[%s4584_s1 + $0x118] sm:$0xff]  ;;  %v71_v21 = vld [vmem:[%s4584_s1 + $0x110] sm:$0xff] }
   0x5   :  { %v262_v19 = vsel %vm165_vm0, %v69_v17, 0.0  ;;  %v271_v22 = vsel %vm165_vm0, %v72_v20, 0.0  ;;  %v268_v23 = vsel %vm165_vm0, %v71_v21, 0.0  ;;  %v86_v24 = vld [vmem:[%s4584_s1 + $0x188] sm:$0xff]  ;;  %v85_v25 = vld [vmem:[%s4584_s1 + $0x180] sm:$0xff] }
   0x6   :  { %v313_v26 = vsel %vm165_vm0, %v86_v24, 0.0  ;;  %v310_v27 = vsel %vm165_vm0, %v85_v25, 0.0  ;;  %v42_v28 = vld [vmem:[%s4584_s1 + $0x28] sm:$0xff]  ;;  %v41_v29 = vld [vmem:[%s4584_s1 + $0x20] sm:$0xff] }
   0x7   :  { %218 = vadd.xlane.f32.xlu1 %v217_v6  ;;  %v58_v30 = vld [vmem:[%s4584_s1 + $0xa8] sm:$0xff] }
   0x8   :  { %170 = vadd.xlane.f32.xlu0 %v169_v7 }
   0xb   :  { %176 = vadd.xlane.f32.xlu1 %v175_v10 }
   0xc   :  { %173 = vadd.xlane.f32.xlu0 %v172_v11 }
   0xf   :  { %224 = vadd.xlane.f32.xlu1 %v223_v14 }
  0x10   :  { %221 = vadd.xlane.f32.xlu0 %v220_v15 }
  0x13   :  { %266 = vadd.xlane.f32.xlu1 %v265_v18 }
  0x14   :  { %263 = vadd.xlane.f32.xlu0 %v262_v19 }
  0x17   :  { %272 = vadd.xlane.f32.xlu1 %v271_v22 }
  0x18   :  { %269 = vadd.xlane.f32.xlu0 %v268_v23 }
  0x1b   :  { %314 = vadd.xlane.f32.xlu1 %v313_v26 }
  0x1c   :  { %311 = vadd.xlane.f32.xlu0 %v310_v27 }
  0x1d   :  { %15 = vsyncpa [#allocation3], 0  ;;  %v181_v31 = vsel %vm165_vm0, %v42_v28, 0.0  ;;  %v178_v32 = vsel %vm165_vm0, %v41_v29, 0.0  ;;  %v57_v33 = vld [vmem:[%s4584_s1 + $0xa0] sm:$0xff]  ;;  %v229_v34 = vsel %vm165_vm0, %v58_v30, 0.0 }
  0x1e   :  { %v226_v35 = vsel %vm165_vm0, %v57_v33, 0.0  ;;  %v88_v36 = vld [vmem:[%s4584_s1 + $0x198] sm:$0xff]  ;;  %v87_v37 = vld [vmem:[%s4584_s1 + $0x190] sm:$0xff]  ;;  %v102_v38 = vld [vmem:[%s4584_s1 + $0x208] sm:$0xff]  ;;  %vm1397_vm1 = vcmask 130112   ;;  %vm1404_vm2 = vcmask 195712  }
  0x1f   :  { %182 = vadd.xlane.f32.xlu1 %v181_v31  ;;  %v319_v39 = vsel %vm165_vm0, %v88_v36, 0.0  ;;  %v316_v40 = vsel %vm165_vm0, %v87_v37, 0.0  ;;  %v101_v41 = vld [vmem:[%s4584_s1 + $0x200] sm:$0xff]  ;;  %v74_v42 = vld [vmem:[%s4584_s1 + $0x128] sm:$0xff]  ;;  %v361_v43 = vsel %vm165_vm0, %v102_v38, 0.0  ;;  %v104_v48 = vld [vmem:[%s4584_s1 + $0x218] sm:$0xff] }
  0x20   :  { %179 = vadd.xlane.f32.xlu0 %v178_v32  ;;  %v358_v44 = vsel %vm165_vm0, %v101_v41, 0.0  ;;  %v73_v45 = vld [vmem:[%s4584_s1 + $0x120] sm:$0xff]  ;;  %v277_v46 = vsel %vm165_vm0, %v74_v42, 0.0  ;;  %v103_v49 = vld [vmem:[%s4584_s1 + $0x210] sm:$0xff]  ;;  %v118_v50 = vld [vmem:[%s4584_s1 + $0x288] sm:$0xff]  ;;  %v367_v51 = vsel %vm165_vm0, %v104_v48, 0.0 }
  0x21   :  { %v274_v47 = vsel %vm165_vm0, %v73_v45, 0.0  ;;  %v364_v52 = vsel %vm165_vm0, %v103_v49, 0.0  ;;  %v117_v53 = vld [vmem:[%s4584_s1 + $0x280] sm:$0xff]  ;;  %v409_v54 = vsel %vm165_vm0, %v118_v50, 0.0  ;;  %v44_v56 = vld [vmem:[%s4584_s1 + $0x38] sm:$0xff]  ;;  %v43_v57 = vld [vmem:[%s4584_s1 + $0x30] sm:$0xff] }
  0x22   :  { %v406_v55 = vsel %vm165_vm0, %v117_v53, 0.0  ;;  %v187_v58 = vsel %vm165_vm0, %v44_v56, 0.0  ;;  %v184_v59 = vsel %vm165_vm0, %v43_v57, 0.0  ;;  %v60_v60 = vld [vmem:[%s4584_s1 + $0xb8] sm:$0xff]  ;;  %v59_v61 = vld [vmem:[%s4584_s1 + $0xb0] sm:$0xff]  ;;  %v90_v0 = vld [vmem:[%s4584_s1 + $0x1a8] sm:$0xff] }
  0x23   :  { %230 = vadd.xlane.f32.xlu1 %v229_v34  ;;  %v235_v62 = vsel %vm165_vm0, %v60_v60, 0.0  ;;  %v232_v63 = vsel %vm165_vm0, %v59_v61, 0.0  ;;  %v89_v1 = vld [vmem:[%s4584_s1 + $0x1a0] sm:$0xff]  ;;  %v325_v2 = vsel %vm165_vm0, %v90_v0, 0.0  ;;  %v120_v4 = vld [vmem:[%s4584_s1 + $0x298] sm:$0xff]  ;;  %v119_v5 = vld [vmem:[%s4584_s1 + $0x290] sm:$0xff] }
  0x24   :  { %227 = vadd.xlane.f32.xlu0 %v226_v35  ;;  %v322_v3 = vsel %vm165_vm0, %v89_v1, 0.0  ;;  %v415_v6 = vsel %vm165_vm0, %v120_v4, 0.0  ;;  %v412_v7 = vsel %vm165_vm0, %v119_v5, 0.0  ;;  %v134_v8 = vld [vmem:[%s4584_s1 + $0x308] sm:$0xff]  ;;  %v133_v9 = vld [vmem:[%s4584_s1 + $0x300] sm:$0xff]  ;;  %v75_v12 = vld [vmem:[%s4584_s1 + $0x130] sm:$0xff] }
  0x25   :  { %v457_v10 = vsel %vm165_vm0, %v134_v8, 0.0  ;;  %v454_v11 = vsel %vm165_vm0, %v133_v9, 0.0  ;;  %v62_v13 = vld [vmem:[%s4584_s1 + $0xc8] sm:$0xff]  ;;  %v280_v14 = vsel %vm165_vm0, %v75_v12, 0.0  ;;  %v76_v16 = vld [vmem:[%s4584_s1 + $0x138] sm:$0xff]  ;;  %v107_v17 = vld [vmem:[%s4584_s1 + $0x230] sm:$0xff] }
  0x26   :  { %v241_v15 = vsel %vm165_vm0, %v62_v13, 0.0  ;;  %v283_v18 = vsel %vm165_vm0, %v76_v16, 0.0  ;;  %v376_v19 = vsel %vm165_vm0, %v107_v17, 0.0  ;;  %v105_v20 = vld [vmem:[%s4584_s1 + $0x220] sm:$0xff]  ;;  %v106_v24 = vld [vmem:[%s4584_s1 + $0x228] sm:$0xff]  ;;  %v47_v25 = vld [vmem:[%s4584_s1 + $0x50] sm:$0xff] }
  0x27   :  { %320 = vadd.xlane.f32.xlu1 %v319_v39  ;;  %v137_v21 = vld [vmem:[%s4584_s1 + $0x320] sm:$0xff]  ;;  %v370_v22 = vsel %vm165_vm0, %v105_v20, 0.0  ;;  %v373_v26 = vsel %vm165_vm0, %v106_v24, 0.0  ;;  %v196_v27 = vsel %vm165_vm0, %v47_v25, 0.0  ;;  %v135_v28 = vld [vmem:[%s4584_s1 + $0x310] sm:$0xff]  ;;  %v136_v32 = vld [vmem:[%s4584_s1 + $0x318] sm:$0xff] }
  0x28   :  { %317 = vadd.xlane.f32.xlu0 %v316_v40  ;;  %v466_v23 = vsel %vm165_vm0, %v137_v21, 0.0  ;;  %v63_v29 = vld [vmem:[%s4584_s1 + $0xd0] sm:$0xff]  ;;  %v460_v30 = vsel %vm165_vm0, %v135_v28, 0.0  ;;  %v93_v33 = vld [vmem:[%s4584_s1 + $0x1c0] sm:$0xff]  ;;  %v463_v34 = vsel %vm165_vm0, %v136_v32, 0.0  ;;  %v150_v40 = vld [vmem:[%s4584_s1 + $0x388] sm:$0xff] }
  0x29   :  { %v244_v31 = vsel %vm165_vm0, %v63_v29, 0.0  ;;  %v334_v35 = vsel %vm165_vm0, %v93_v33, 0.0  ;;  %v149_v36 = vld [vmem:[%s4584_s1 + $0x380] sm:$0xff]  ;;  %v123_v37 = vld [vmem:[%s4584_s1 + $0x2b0] sm:$0xff]  ;;  %v505_v42 = vsel %vm165_vm0, %v150_v40, 0.0  ;;  %v46_v48 = vld [vmem:[%s4584_s1 + $0x48] sm:$0xff] }
  0x2a   :  { %v502_v38 = vsel %vm165_vm0, %v149_v36, 0.0  ;;  %v424_v39 = vsel %vm165_vm0, %v123_v37, 0.0  ;;  %v153_v41 = vld [vmem:[%s4584_s1 + $0x3a0] sm:$0xff]  ;;  %v79_v45 = vld [vmem:[%s4584_s1 + $0x150] sm:$0xff]  ;;  %v193_v50 = vsel %vm165_vm0, %v46_v48, 0.0  ;;  %v92_v61 = vld [vmem:[%s4584_s1 + $0x1b8] sm:$0xff] }
  0x2b   :  { %362 = vadd.xlane.f32.xlu1 %v361_v43  ;;  %v514_v43 = vsel %vm165_vm0, %v153_v41, 0.0  ;;  %v109_v49 = vld [vmem:[%s4584_s1 + $0x240] sm:$0xff]  ;;  %v91_v57 = vld [vmem:[%s4584_s1 + $0x1b0] sm:$0xff]  ;;  %v122_v5 = vld [vmem:[%s4584_s1 + $0x2a8] sm:$0xff]  ;;  %vm1411_vm3 = vcmask 261312   ;;  %vm1418_vm4 = vcmask 326912  }
  0x2c   :  { %359 = vadd.xlane.f32.xlu0 %v358_v44  ;;  %v45_v44 = vld [vmem:[%s4584_s1 + $0x40] sm:$0xff]  ;;  %v151_v9 = vld [vmem:[%s4584_s1 + $0x390] sm:$0xff]  ;;  %v152_v13 = vld [vmem:[%s4584_s1 + $0x398] sm:$0xff]  ;;  %vm1425_vm5 = vcmask 392512   ;;  %vm1432_vm6 = vcmask 458112   ;;  %vm1439_vm7 = vcmask 523712  }
  0x2d   :  { %v61_v53 = vld [vmem:[%s4584_s1 + $0xc0] sm:$0xff]  ;;  %v108_v29 = vld [vmem:[%s4584_s1 + $0x238] sm:$0xff]  ;;  %v67_v36 = vld [vmem:[%s4584_s1 + $0xf0] sm:$0xff]  ;;  %vm1446_vm8 = vcmask 589312   ;;  %vm1453_vm9 = vcmask 654912   ;;  %vm1460_vm10 = vcmask 720512  }
  0x2e   :  { %v121_v1 = vld [vmem:[%s4584_s1 + $0x2a0] sm:$0xff]  ;;  %v379_v33 = vsel %vm165_vm0, %v108_v29, 0.0  ;;  %v256_v40 = vsel %vm165_vm0, %v67_v36, 0.0  ;;  %v48_v41 = vld [vmem:[%s4584_s1 + $0x58] sm:$0xff]  ;;  %v127_v48 = vld [vmem:[%s4584_s1 + $0x2d0] sm:$0xff]  ;;  %vm2734_vm11 = vmmov 0  }
  0x2f   :  { %278 = vadd.xlane.f32.xlu1 %v277_v46  ;;  %v190_v46 = vsel %vm165_vm0, %v45_v44, 0.0  ;;  %v77_v17 = vld [vmem:[%s4584_s1 + $0x140] sm:$0xff]  ;;  %v50_v29 = vld [vmem:[%s4584_s1 + $0x68] sm:$0xff]  ;;  %vm1467_vm12 = vcmask 786112   ;;  %vm1474_vm13 = vcmask 851712   ;;  %vm1481_vm14 = vcmask 917312  }
  0x30   :  { %275 = vadd.xlane.f32.xlu0 %v274_v47  ;;  %v292_v47 = vsel %vm165_vm0, %v79_v45, 0.0  ;;  %v286_v21 = vsel %vm165_vm0, %v77_v17, 0.0  ;;  %v141_v24 = vld [vmem:[%s4584_s1 + $0x340] sm:$0xff]  ;;  %v199_v45 = vsel %vm165_vm0, %v48_v41, 0.0  ;;  %vm1488_vm15 = vcmask 982912  }
  0x31   :  { %v478_v28 = vsel %vm165_vm0, %v141_v24, 0.0 }
  0x33   :  { %368 = vadd.xlane.f32.xlu1 %v367_v51  ;;  %v382_v51 = vsel %vm165_vm0, %v109_v49, 0.0 }
  0x34   :  { %365 = vadd.xlane.f32.xlu0 %v364_v52  ;;  %v2732_v52 = vmov 0  }
  0x35   :  { %2674 = vset.pattern.permute.xlu0 %v2732_v52  ;;  %2675 = vset.pattern.permute.xlu1 %v2732_v52  ;;  %v436_v52 = vsel %vm165_vm0, %v127_v48, 0.0  ;;  %v145_v48 = vld [vmem:[%s4584_s1 + $0x360] sm:$0xff] }
  0x37   :  { %410 = vadd.xlane.f32.xlu1 %v409_v54  ;;  %v139_v54 = vld [vmem:[%s4584_s1 + $0x330] sm:$0xff] }
  0x38   :  { %407 = vadd.xlane.f32.xlu0 %v406_v55  ;;  %v238_v55 = vsel %vm165_vm0, %v61_v53, 0.0  ;;  %v472_v56 = vsel %vm165_vm0, %v139_v54, 0.0  ;;  %v94_v53 = vld [vmem:[%s4584_s1 + $0x1c8] sm:$0xff]  ;;  %v157_v54 = vld [vmem:[%s4584_s1 + $0x3c0] sm:$0xff] }
  0x3b   :  { %188 = vadd.xlane.f32.xlu1 %v187_v58  ;;  %v49_v58 = vld [vmem:[%s4584_s1 + $0x60] sm:$0xff] }
  0x3c   :  { %185 = vadd.xlane.f32.xlu0 %v184_v59  ;;  %v328_v59 = vsel %vm165_vm0, %v91_v57, 0.0  ;;  %v202_v60 = vsel %vm165_vm0, %v49_v58, 0.0  ;;  %v337_v57 = vsel %vm165_vm0, %v94_v53, 0.0  ;;  %v526_v58 = vsel %vm165_vm0, %v157_v54, 0.0 }
  0x3d   :  { %v490_v54 = vsel %vm165_vm0, %v145_v48, 0.0 }
  0x3f   :  { %236 = vadd.xlane.f32.xlu1 %v235_v62  ;;  %v65_v62 = vld [vmem:[%s4584_s1 + $0xe0] sm:$0xff] }
  0x40   :  { %233 = vadd.xlane.f32.xlu0 %v232_v63  ;;  %v331_v63 = vsel %vm165_vm0, %v92_v61, 0.0  ;;  %v250_v0 = vsel %vm165_vm0, %v65_v62, 0.0 }
  0x43   :  { %326 = vadd.xlane.f32.xlu1 %v325_v2  ;;  %v95_v2 = vld [vmem:[%s4584_s1 + $0x1d0] sm:$0xff] }
  0x44   :  { %323 = vadd.xlane.f32.xlu0 %v322_v3  ;;  %v418_v3 = vsel %vm165_vm0, %v121_v1, 0.0  ;;  %v340_v4 = vsel %vm165_vm0, %v95_v2, 0.0  ;;  %v154_v1 = vld [vmem:[%s4584_s1 + $0x3a8] sm:$0xff]  ;;  %v113_v2 = vld [vmem:[%s4584_s1 + $0x260] sm:$0xff] }
  0x47   :  { %416 = vadd.xlane.f32.xlu1 %v415_v6  ;;  %v125_v6 = vld [vmem:[%s4584_s1 + $0x2c0] sm:$0xff] }
  0x48   :  { %413 = vadd.xlane.f32.xlu0 %v412_v7  ;;  %v421_v7 = vsel %vm165_vm0, %v122_v5, 0.0  ;;  %v430_v8 = vsel %vm165_vm0, %v125_v6, 0.0  ;;  %v517_v5 = vsel %vm165_vm0, %v154_v1, 0.0  ;;  %v394_v6 = vsel %vm165_vm0, %v113_v2, 0.0  ;;  %v156_v1 = vld [vmem:[%s4584_s1 + $0x3b8] sm:$0xff]  ;;  %v161_v2 = vld [vmem:[%s4584_s1 + $0x3e0] sm:$0xff] }
  0x4b   :  { %458 = vadd.xlane.f32.xlu1 %v457_v10  ;;  %v155_v10 = vld [vmem:[%s4584_s1 + $0x3b0] sm:$0xff] }
  0x4c   :  { %455 = vadd.xlane.f32.xlu0 %v454_v11  ;;  %v508_v11 = vsel %vm165_vm0, %v151_v9, 0.0  ;;  %v520_v12 = vsel %vm165_vm0, %v155_v10, 0.0 }
  0x4f   :  { %281 = vadd.xlane.f32.xlu1 %v280_v14  ;;  %v81_v14 = vld [vmem:[%s4584_s1 + $0x160] sm:$0xff] }
  0x50   :  { %242 = vadd.xlane.f32.xlu0 %v241_v15  ;;  %v511_v15 = vsel %vm165_vm0, %v152_v13, 0.0  ;;  %v298_v16 = vsel %vm165_vm0, %v81_v14, 0.0  ;;  %v110_v13 = vld [vmem:[%s4584_s1 + $0x248] sm:$0xff]  ;;  %v99_v14 = vld [vmem:[%s4584_s1 + $0x1f0] sm:$0xff] }
  0x51   :  { %v385_v17 = vsel %vm165_vm0, %v110_v13, 0.0 }
  0x53   :  { %284 = vadd.xlane.f32.xlu1 %v283_v18  ;;  %v111_v18 = vld [vmem:[%s4584_s1 + $0x250] sm:$0xff] }
  0x54   :  { %377 = vadd.xlane.f32.xlu0 %v376_v19 }
  0x57   :  { %371 = vadd.xlane.f32.xlu1 %v370_v22  ;;  %v388_v22 = vsel %vm165_vm0, %v111_v18, 0.0  ;;  %v352_v18 = vsel %vm165_vm0, %v99_v14, 0.0 }
  0x58   :  { %467 = vadd.xlane.f32.xlu0 %v466_v23  ;;  %v78_v23 = vld [vmem:[%s4584_s1 + $0x148] sm:$0xff] }
  0x5b   :  { %374 = vadd.xlane.f32.xlu1 %v373_v26 }
  0x5c   :  { %197 = vadd.xlane.f32.xlu0 %v196_v27  ;;  %v289_v27 = vsel %vm165_vm0, %v78_v23, 0.0 }
  0x5f   :  { %461 = vadd.xlane.f32.xlu1 %v460_v30  ;;  %v51_v30 = vld [vmem:[%s4584_s1 + $0x70] sm:$0xff] }
  0x60   :  { %245 = vadd.xlane.f32.xlu0 %v244_v31 }
  0x63   :  { %464 = vadd.xlane.f32.xlu1 %v463_v34  ;;  %v208_v34 = vsel %vm165_vm0, %v51_v30, 0.0  ;;  %v159_v30 = vld [vmem:[%s4584_s1 + $0x3d0] sm:$0xff] }
  0x64   :  { %335 = vadd.xlane.f32.xlu0 %v334_v35  ;;  %v138_v35 = vld [vmem:[%s4584_s1 + $0x328] sm:$0xff]  ;;  %v532_v36 = vsel %vm165_vm0, %v159_v30, 0.0 }
  0x67   :  { %503 = vadd.xlane.f32.xlu1 %v502_v38 }
  0x68   :  { %425 = vadd.xlane.f32.xlu0 %v424_v39  ;;  %v469_v39 = vsel %vm165_vm0, %v138_v35, 0.0  ;;  %v205_v35 = vsel %vm165_vm0, %v50_v29, 0.0 }
  0x6b   :  { %506 = vadd.xlane.f32.xlu1 %v505_v42  ;;  %v97_v42 = vld [vmem:[%s4584_s1 + $0x1e0] sm:$0xff] }
  0x6c   :  { %515 = vadd.xlane.f32.xlu0 %v514_v43 }
  0x6f   :  { %191 = vadd.xlane.f32.xlu1 %v190_v46  ;;  %v346_v46 = vsel %vm165_vm0, %v97_v42, 0.0 }
  0x70   :  { %293 = vadd.xlane.f32.xlu0 %v292_v47  ;;  %v64_v47 = vld [vmem:[%s4584_s1 + $0xd8] sm:$0xff] }
  0x73   :  { %194 = vadd.xlane.f32.xlu1 %v193_v50 }
  0x74   :  { %383 = vadd.xlane.f32.xlu0 %v382_v51  ;;  %v247_v51 = vsel %vm165_vm0, %v64_v47, 0.0  ;;  %v96_v47 = vld [vmem:[%s4584_s1 + $0x1d8] sm:$0xff] }
  0x75   :  { %v343_v53 = vsel %vm165_vm0, %v96_v47, 0.0 }
  0x77   :  { %239 = vadd.xlane.f32.xlu1 %v238_v55 }
  0x78   :  { %473 = vadd.xlane.f32.xlu0 %v472_v56 }
  0x7b   :  { %329 = vadd.xlane.f32.xlu1 %v328_v59  ;;  %v124_v59 = vld [vmem:[%s4584_s1 + $0x2b8] sm:$0xff] }
  0x7c   :  { %203 = vadd.xlane.f32.xlu0 %v202_v60  ;;  %v83_v60 = vld [vmem:[%s4584_s1 + $0x170] sm:$0xff] }
  0x7f   :  { %332 = vadd.xlane.f32.xlu1 %v331_v63  ;;  %v427_v63 = vsel %vm165_vm0, %v124_v59, 0.0 }
  0x80   :  { %251 = vadd.xlane.f32.xlu0 %v250_v0  ;;  %v304_v0 = vsel %vm165_vm0, %v83_v60, 0.0 }
  0x83   :  { %419 = vadd.xlane.f32.xlu1 %v418_v3 }
  0x84   :  { %341 = vadd.xlane.f32.xlu0 %v340_v4 }
  0x87   :  { %422 = vadd.xlane.f32.xlu1 %v421_v7  ;;  %v80_v7 = vld [vmem:[%s4584_s1 + $0x158] sm:$0xff] }
  0x88   :  { %431 = vadd.xlane.f32.xlu0 %v430_v8  ;;  %v143_v8 = vld [vmem:[%s4584_s1 + $0x350] sm:$0xff] }
  0x8b   :  { %509 = vadd.xlane.f32.xlu1 %v508_v11  ;;  %v295_v11 = vsel %vm165_vm0, %v80_v7, 0.0  ;;  %v523_v7 = vsel %vm165_vm0, %v156_v1, 0.0 }
  0x8c   :  { %521 = vadd.xlane.f32.xlu0 %v520_v12  ;;  %v484_v12 = vsel %vm165_vm0, %v143_v8, 0.0  ;;  %v538_v8 = vsel %vm165_vm0, %v161_v2, 0.0 }
  0x8f   :  { %512 = vadd.xlane.f32.xlu1 %v511_v15 }
  0x90   :  { %299 = vadd.xlane.f32.xlu0 %v298_v16  ;;  %v3087_v19 = vpop.xlane.xlu1 %215 }
  0x91   :  { %v3089_v20 = vpop.xlane.xlu0 %167 }
  0x93   :  { %287 = vadd.xlane.f32.xlu1 %v286_v21  ;;  %v140_v21 = vld [vmem:[%s4584_s1 + $0x338] sm:$0xff] }
  0x94   :  { %389 = vadd.xlane.f32.xlu0 %v388_v22  ;;  %v3099_v25 = vpop.xlane.xlu1 %218  ;;  %v129_v22 = vld [vmem:[%s4584_s1 + $0x2e0] sm:$0xff] }
  0x95   :  { %v3101_v26 = vpop.xlane.xlu0 %170 }
  0x97   :  { %290 = vadd.xlane.f32.xlu1 %v289_v27  ;;  %v475_v27 = vsel %vm165_vm0, %v140_v21, 0.0  ;;  %v112_v21 = vld [vmem:[%s4584_s1 + $0x258] sm:$0xff] }
  0x98   :  { %479 = vadd.xlane.f32.xlu0 %v478_v28  ;;  %v3111_v31 = vpop.xlane.xlu1 %176  ;;  %v442_v28 = vsel %vm165_vm0, %v129_v22, 0.0  ;;  %v163_v22 = vld [vmem:[%s4584_s1 + $0x3f0] sm:$0xff]  ;;  %v391_v29 = vsel %vm165_vm0, %v112_v21, 0.0 }
  0x99   :  { %v3113_v32 = vpop.xlane.xlu0 %173  ;;  %v544_v30 = vsel %vm165_vm0, %v163_v22, 0.0 }
  0x9b   :  { %380 = vadd.xlane.f32.xlu1 %v379_v33 }
  0x9c   :  { %209 = vadd.xlane.f32.xlu0 %v208_v34  ;;  %v3123_v37 = vpop.xlane.xlu1 %224 }
  0x9d   :  { %v3125_v38 = vpop.xlane.xlu0 %221 }
  0x9f   :  { %470 = vadd.xlane.f32.xlu1 %v469_v39  ;;  %v66_v39 = vld [vmem:[%s4584_s1 + $0xe8] sm:$0xff] }
  0xa0   :  { %257 = vadd.xlane.f32.xlu0 %v256_v40  ;;  %v3135_v43 = vpop.xlane.xlu1 %266  ;;  %v115_v40 = vld [vmem:[%s4584_s1 + $0x270] sm:$0xff] }
  0xa1   :  { %v3137_v44 = vpop.xlane.xlu0 %263 }
  0xa3   :  { %200 = vadd.xlane.f32.xlu1 %v199_v45  ;;  %v253_v45 = vsel %vm165_vm0, %v66_v39, 0.0 }
  0xa4   :  { %347 = vadd.xlane.f32.xlu0 %v346_v46  ;;  %v3147_v49 = vpop.xlane.xlu1 %272  ;;  %v400_v46 = vsel %vm165_vm0, %v115_v40, 0.0 }
  0xa5   :  { %v3149_v50 = vpop.xlane.xlu0 %269 }
  0xa7   :  { %248 = vadd.xlane.f32.xlu1 %v247_v51 }
  0xa8   :  { %437 = vadd.xlane.f32.xlu0 %v436_v52  ;;  %v3159_v55 = vpop.xlane.xlu1 %314 }
  0xa9   :  { %v3161_v56 = vpop.xlane.xlu0 %311 }
  0xab   :  { %338 = vadd.xlane.f32.xlu1 %v337_v57  ;;  %v126_v57 = vld [vmem:[%s4584_s1 + $0x2c8] sm:$0xff] }
  0xac   :  { %527 = vadd.xlane.f32.xlu0 %v526_v58  ;;  %v3171_v61 = vpop.xlane.xlu1 %182  ;;  %v131_v58 = vld [vmem:[%s4584_s1 + $0x2f0] sm:$0xff] }
  0xad   :  { %v3173_v62 = vpop.xlane.xlu0 %179 }
  0xaf   :  { %428 = vadd.xlane.f32.xlu1 %v427_v63  ;;  %v433_v63 = vsel %vm165_vm0, %v126_v57, 0.0 }
  0xb0   :  { %305 = vadd.xlane.f32.xlu0 %v304_v0  ;;  %v3183_v3 = vpop.xlane.xlu1 %230  ;;  %v448_v0 = vsel %vm165_vm0, %v131_v58, 0.0 }
  0xb1   :  { %v3185_v4 = vpop.xlane.xlu0 %227 }
  0xb3   :  { %518 = vadd.xlane.f32.xlu1 %v517_v5 }
  0xb4   :  { %395 = vadd.xlane.f32.xlu0 %v394_v6  ;;  %v3195_v9 = vpop.xlane.xlu1 %320 }
  0xb5   :  { %v3197_v10 = vpop.xlane.xlu0 %317 }
  0xb7   :  { %296 = vadd.xlane.f32.xlu1 %v295_v11  ;;  %v82_v11 = vld [vmem:[%s4584_s1 + $0x168] sm:$0xff] }
  0xb8   :  { %485 = vadd.xlane.f32.xlu0 %v484_v12  ;;  %v3207_v15 = vpop.xlane.xlu1 %362  ;;  %v147_v12 = vld [vmem:[%s4584_s1 + $0x370] sm:$0xff] }
  0xb9   :  { %v3209_v16 = vpop.xlane.xlu0 %359 }
  0xbb   :  { %386 = vadd.xlane.f32.xlu1 %v385_v17  ;;  %v301_v17 = vsel %vm165_vm0, %v82_v11, 0.0 }
  0xbc   :  { %353 = vadd.xlane.f32.xlu0 %v352_v18  ;;  %v3219_v23 = vpop.xlane.xlu1 %278  ;;  %v496_v18 = vsel %vm165_vm0, %v147_v12, 0.0 }
  0xbd   :  { %v3221_v24 = vpop.xlane.xlu0 %275 }
  0xbf   :  { %476 = vadd.xlane.f32.xlu1 %v475_v27 }
  0xc0   :  { %443 = vadd.xlane.f32.xlu0 %v442_v28  ;;  %v3231_v33 = vpop.xlane.xlu1 %368 }
  0xc1   :  { %v3233_v34 = vpop.xlane.xlu0 %365 }
  0xc3   :  { %206 = vadd.xlane.f32.xlu1 %v205_v35  ;;  %v142_v35 = vld [vmem:[%s4584_s1 + $0x348] sm:$0xff] }
  0xc4   :  { %533 = vadd.xlane.f32.xlu0 %v532_v36  ;;  %v3243_v41 = vpop.xlane.xlu1 %410  ;;  %v481_v40 = vsel %vm165_vm0, %v142_v35, 0.0 }
  0xc5   :  { %v3245_v42 = vpop.xlane.xlu0 %407 }
  0xc7   :  { %254 = vadd.xlane.f32.xlu1 %v253_v45  ;;  %v52_v45 = vld [vmem:[%s4584_s1 + $0x78] sm:$0xff] }
  0xc8   :  { %401 = vadd.xlane.f32.xlu0 %v400_v46  ;;  %v3255_v51 = vpop.xlane.xlu1 %188  ;;  %v211_v48 = vsel %vm165_vm0, %v52_v45, 0.0 }
  0xc9   :  { %v3257_v52 = vpop.xlane.xlu0 %185 }
  0xcb   :  { %344 = vadd.xlane.f32.xlu1 %v343_v53  ;;  %v68_v53 = vld [vmem:[%s4584_s1 + $0xf8] sm:$0xff] }
  0xcc   :  { %491 = vadd.xlane.f32.xlu0 %v490_v54  ;;  %v3267_v59 = vpop.xlane.xlu1 %236  ;;  %v259_v58 = vsel %vm165_vm0, %v68_v53, 0.0 }
  0xcd   :  { %v3269_v60 = vpop.xlane.xlu0 %233 }
  0xcf   :  { %434 = vadd.xlane.f32.xlu1 %v433_v63  ;;  %v98_v63 = vld [vmem:[%s4584_s1 + $0x1e8] sm:$0xff] }
  0xd0   :  { %449 = vadd.xlane.f32.xlu0 %v448_v0  ;;  %v3279_v5 = vpop.xlane.xlu1 %326  ;;  %v349_v2 = vsel %vm165_vm0, %v98_v63, 0.0 }
  0xd1   :  { %v3281_v6 = vpop.xlane.xlu0 %323 }
  0xd3   :  { %524 = vadd.xlane.f32.xlu1 %v523_v7  ;;  %v128_v7 = vld [vmem:[%s4584_s1 + $0x2d8] sm:$0xff] }
  0xd4   :  { %539 = vadd.xlane.f32.xlu0 %v538_v8  ;;  %v3291_v13 = vpop.xlane.xlu1 %416  ;;  %v439_v12 = vsel %vm165_vm0, %v128_v7, 0.0 }
  0xd5   :  { %v3293_v14 = vpop.xlane.xlu0 %413 }
  0xd7   :  { %302 = vadd.xlane.f32.xlu1 %v301_v17  ;;  %v158_v17 = vld [vmem:[%s4584_s1 + $0x3c8] sm:$0xff] }
  0xd8   :  { %497 = vadd.xlane.f32.xlu0 %v496_v18  ;;  %v3303_v27 = vpop.xlane.xlu1 %458  ;;  %v550_v18 = vld [vmem:[%s4583_s0] sm:$0xff] }
  0xd9   :  { %v3305_v28 = vpop.xlane.xlu0 %455 }
  0xdb   :  { %392 = vadd.xlane.f32.xlu1 %v391_v29  ;;  %v529_v29 = vsel %vm165_vm0, %v158_v17, 0.0 }
  0xdc   :  { %545 = vadd.xlane.f32.xlu0 %v544_v30  ;;  %v3312_v36 = vpop.xlane.xlu1 %281  ;;  %v84_v30 = vld [vmem:[%s4584_s1 + $0x178] sm:$0xff] }
  0xdd   :  { %v3314_v39 = vpop.xlane.xlu0 %242  ;;  %v307_v45 = vsel %vm165_vm0, %v84_v30, 0.0 }
  0xde   :  { %4601 = vst [vmem:[#allocation5_spill] sm:$0xff] %v3314_v39 }
  0xdf   :  { %482 = vadd.xlane.f32.xlu1 %v481_v40 }
  0xe0   :  { %v3320_v46 = vpop.xlane.xlu1 %284 }
  0xe1   :  { %v3322_v47 = vpop.xlane.xlu0 %377 }
  0xe2   :  { %4602 = vst [vmem:[#allocation6_spill] sm:$0xff] %v3322_v47 }
  0xe3   :  { %212 = vadd.xlane.f32.xlu1 %v211_v48  ;;  %v114_v48 = vld [vmem:[%s4584_s1 + $0x268] sm:$0xff] }
  0xe4   :  { %v3328_v54 = vpop.xlane.xlu1 %371  ;;  %v397_v63 = vsel %vm165_vm0, %v114_v48, 0.0  ;;  %v130_v48 = vld [vmem:[%s4584_s1 + $0x2e8] sm:$0xff] }
  0xe5   :  { %v3330_v57 = vpop.xlane.xlu0 %467 }
  0xe6   :  { %4603 = vst [vmem:[#allocation7_spill] sm:$0xff] %v3330_v57 }
  0xe7   :  { %260 = vadd.xlane.f32.xlu1 %v259_v58 }
  0xe8   :  { %v3336_v0 = vpop.xlane.xlu1 %374 }
  0xe9   :  { %v3338_v1 = vpop.xlane.xlu0 %197 }
  0xea   :  { %4604 = vst [vmem:[#allocation8_spill] sm:$0xff] %v3338_v1 }
  0xeb   :  { %350 = vadd.xlane.f32.xlu1 %v349_v2  ;;  %v144_v2 = vld [vmem:[%s4584_s1 + $0x358] sm:$0xff] }
  0xec   :  { %v3344_v8 = vpop.xlane.xlu1 %461  ;;  %v487_v17 = vsel %vm165_vm0, %v144_v2, 0.0  ;;  %v445_v2 = vsel %vm165_vm0, %v130_v48, 0.0 }
  0xed   :  { %v3346_v11 = vpop.xlane.xlu0 %245 }
  0xee   :  { %4605 = vst [vmem:[#allocation9_spill] sm:$0xff] %v3346_v11 }
  0xef   :  { %440 = vadd.xlane.f32.xlu1 %v439_v12 }
  0xf0   :  { %v3355_v21 = vpop.xlane.xlu1 %464 }
  0xf1   :  { %v3357_v22 = vpop.xlane.xlu0 %335 }
  0xf2   :  { %4606 = vst [vmem:[#allocation10_spill] sm:$0xff] %v3357_v22  ;;  %553 = vperm.xlu0 %2674, %v550_v18   ;;  %v100_v18 = vld [vmem:[%s4584_s1 + $0x1f8] sm:$0xff] }
  0xf3   :  { %530 = vadd.xlane.f32.xlu1 %v529_v29 }
  0xf4   :  { %v3363_v35 = vpop.xlane.xlu1 %503 }
  0xf5   :  { %v3365_v40 = vpop.xlane.xlu0 %425 }
  0xf6   :  { %4607 = vst [vmem:[#allocation11_spill] sm:$0xff] %v3365_v40 }
  0xf7   :  { %308 = vadd.xlane.f32.xlu1 %v307_v45  ;;  %v355_v45 = vsel %vm165_vm0, %v100_v18, 0.0 }
  0xf8   :  { %v3371_v53 = vpop.xlane.xlu1 %506 }
  0xf9   :  { %v3373_v58 = vpop.xlane.xlu0 %515 }
  0xfa   :  { %4608 = vst [vmem:[#allocation12_spill] sm:$0xff] %v3373_v58 }
  0xfb   :  { %398 = vadd.xlane.f32.xlu1 %v397_v63 }
  0xfc   :  { %v3379_v7 = vpop.xlane.xlu1 %191 }
  0xfd   :  { %v3381_v12 = vpop.xlane.xlu0 %293 }
  0xfe   :  { %4609 = vst [vmem:[#allocation13_spill] sm:$0xff] %v3381_v12 }
  0xff   :  { %488 = vadd.xlane.f32.xlu1 %v487_v17  ;;  %v160_v17 = vld [vmem:[%s4584_s1 + $0x3d8] sm:$0xff] }
 0x100   :  { %v3387_v29 = vpop.xlane.xlu1 %194  ;;  %v535_v18 = vsel %vm165_vm0, %v160_v17, 0.0 }
 0x101   :  { %v3389_v30 = vpop.xlane.xlu0 %383 }
 0x102   :  { %4610 = vst [vmem:[#allocation14_spill] sm:$0xff] %v3389_v30 }
 0x103   :  { %356 = vadd.xlane.f32.xlu1 %v355_v45  ;;  %v116_v45 = vld [vmem:[%s4584_s1 + $0x278] sm:$0xff] }
 0x104   :  { %v3395_v63 = vpop.xlane.xlu1 %239  ;;  %v403_v48 = vsel %vm165_vm0, %v116_v45, 0.0 }
 0x105   :  { %v3397_v12 = vpop.xlane.xlu0 %473 }
 0x106   :  { %4611 = vst [vmem:[#allocation15_spill] sm:$0xff] %v3397_v12 }
 0x107   :  { %446 = vadd.xlane.f32.xlu1 %v445_v2  ;;  %v146_v2 = vld [vmem:[%s4584_s1 + $0x368] sm:$0xff] }
 0x108   :  { %v3403_v58 = vpop.xlane.xlu1 %329  ;;  %v493_v17 = vsel %vm165_vm0, %v146_v2, 0.0 }
 0x109   :  { %4612 = vst [vmem:[#allocation16_spill] sm:$0xff] %v3403_v58  ;;  %v3405_v30 = vpop.xlane.xlu0 %203 }
 0x10a   :  { %4613 = vst [vmem:[#allocation17_spill] sm:$0xff] %v3405_v30 }
 0x10b   :  { %536 = vadd.xlane.f32.xlu1 %v535_v18  ;;  %v132_v18 = vld [vmem:[%s4584_s1 + $0x2f8] sm:$0xff] }
 0x10c   :  { %v3411_v40 = vpop.xlane.xlu1 %332  ;;  %v451_v45 = vsel %vm165_vm0, %v132_v18, 0.0 }
 0x10d   :  { %4614 = vst [vmem:[#allocation18_spill] sm:$0xff] %v3411_v40  ;;  %v3413_v12 = vpop.xlane.xlu0 %251 }
 0x10e   :  { %4615 = vst [vmem:[#allocation19_spill] sm:$0xff] %v3413_v12 }
 0x10f   :  { %404 = vadd.xlane.f32.xlu1 %v403_v48  ;;  %v162_v48 = vld [vmem:[%s4584_s1 + $0x3e8] sm:$0xff] }
 0x110   :  { %v3419_v22 = vpop.xlane.xlu1 %419  ;;  %v541_v2 = vsel %vm165_vm0, %v162_v48, 0.0 }
 0x111   :  { %4616 = vst [vmem:[#allocation20_spill] sm:$0xff] %v3419_v22  ;;  %v3421_v30 = vpop.xlane.xlu0 %341 }
 0x112   :  { %4617 = vst [vmem:[#allocation21_spill] sm:$0xff] %v3421_v30 }
 0x113   :  { %494 = vadd.xlane.f32.xlu1 %v493_v17  ;;  %v148_v17 = vld [vmem:[%s4584_s1 + $0x378] sm:$0xff] }
 0x114   :  { %v3427_v11 = vpop.xlane.xlu1 %422  ;;  %v499_v18 = vsel %vm165_vm0, %v148_v17, 0.0 }
 0x115   :  { %4618 = vst [vmem:[#allocation22_spill] sm:$0xff] %v3427_v11  ;;  %v3429_v12 = vpop.xlane.xlu0 %431 }
 0x116   :  { %4619 = vst [vmem:[#allocation23_spill] sm:$0xff] %v3429_v12 }
 0x117   :  { %452 = vadd.xlane.f32.xlu1 %v451_v45  ;;  %v164_v45 = vld [vmem:[%s4584_s1 + $0x3f8] sm:$0xff] }
 0x118   :  { %v3435_v1 = vpop.xlane.xlu1 %509  ;;  %v547_v48 = vsel %vm165_vm0, %v164_v45, 0.0  ;;  %vm1495_vm0 = vcmask 1048512  }
 0x119   :  { %4620 = vst [vmem:[#allocation24_spill] sm:$0xff] %v3435_v1  ;;  %v3437_v30 = vpop.xlane.xlu0 %521 }
 0x11a   :  { %4621 = vst [vmem:[#allocation25_spill] sm:$0xff] %v3437_v30 }
 0x11b   :  { %542 = vadd.xlane.f32.xlu1 %v541_v2 }
 0x11c   :  { %v3443_v57 = vpop.xlane.xlu1 %512 }
 0x11d   :  { %4622 = vst [vmem:[#allocation26_spill] sm:$0xff] %v3443_v57  ;;  %v3445_v12 = vpop.xlane.xlu0 %299 }
 0x11e   :  { %4623 = vst [vmem:[#allocation27_spill] sm:$0xff] %v3445_v12 }
 0x11f   :  { %500 = vadd.xlane.f32.xlu1 %v499_v18 }
 0x120   :  { %v3451_v47 = vpop.xlane.xlu1 %287 }
 0x121   :  { %4624 = vst [vmem:[#allocation28_spill] sm:$0xff] %v3451_v47  ;;  %v3453_v30 = vpop.xlane.xlu0 %389 }
 0x122   :  { %4625 = vst [vmem:[#allocation29_spill] sm:$0xff] %v3453_v30 }
 0x123   :  { %548 = vadd.xlane.f32.xlu1 %v547_v48 }
 0x124   :  { %v3456_v1 = vpop.xlane.xlu1 %290 }
 0x125   :  { %4626 = vst [vmem:[#allocation30_spill] sm:$0xff] %v3456_v1  ;;  %v3458_v2 = vpop.xlane.xlu0 %479 }
 0x126   :  { %4627 = vst [vmem:[#allocation31_spill] sm:$0xff] %v3458_v2 }
 0x128   :  { %v3460_v57 = vpop.xlane.xlu1 %380 }
 0x129   :  { %4628 = vst [vmem:[#allocation32_spill] sm:$0xff] %v3460_v57  ;;  %v3462_v12 = vpop.xlane.xlu0 %209 }
 0x12a   :  { %4629 = vst [vmem:[#allocation33_spill] sm:$0xff] %v3462_v12 }
 0x12c   :  { %v3466_v11 = vpop.xlane.xlu1 %470 }
 0x12d   :  { %v3464_v17 = vpop.xlane.xlu0 %257  ;;  %4631 = vst [vmem:[#allocation35_spill] sm:$0xff] %v3466_v11 }
 0x12e   :  { %4630 = vst [vmem:[#allocation34_spill] sm:$0xff] %v3464_v17 }
 0x130   :  { %v3470_v47 = vpop.xlane.xlu1 %200 }
 0x131   :  { %v3468_v18 = vpop.xlane.xlu0 %347  ;;  %4633 = vst [vmem:[#allocation37_spill] sm:$0xff] %v3470_v47 }
 0x132   :  { %4632 = vst [vmem:[#allocation36_spill] sm:$0xff] %v3468_v18 }
 0x134   :  { %v3476_v48 = vpop.xlane.xlu1 %248 }
 0x135   :  { %v3472_v30 = vpop.xlane.xlu0 %437  ;;  %4636 = vst [vmem:[#allocation40_spill] sm:$0xff] %v3476_v48 }
 0x136   :  { %4634 = vst [vmem:[#allocation38_spill] sm:$0xff] %v3472_v30 }
 0x138   :  { %v3480_v2 = vpop.xlane.xlu1 %338 }
 0x139   :  { %v3474_v45 = vpop.xlane.xlu0 %527  ;;  %4638 = vst [vmem:[#allocation42_spill] sm:$0xff] %v3480_v2 }
 0x13a   :  { %4635 = vst [vmem:[#allocation39_spill] sm:$0xff] %v3474_v45 }
 0x13c   :  { %v3486_v17 = vpop.xlane.xlu1 %428 }
 0x13d   :  { %v3478_v1 = vpop.xlane.xlu0 %305  ;;  %4641 = vst [vmem:[#allocation45_spill] sm:$0xff] %v3486_v17 }
 0x13e   :  { %4637 = vst [vmem:[#allocation41_spill] sm:$0xff] %v3478_v1 }
 0x140   :  { %v3490_v18 = vpop.xlane.xlu1 %518 }
 0x141   :  { %v3482_v57 = vpop.xlane.xlu0 %395  ;;  %4643 = vst [vmem:[#allocation47_spill] sm:$0xff] %v3490_v18  ;;  %v4594_v18 = vlaneseq }
 0x142   :  { %4639 = vst [vmem:[#allocation43_spill] sm:$0xff] %v3482_v57 }
 0x144   :  { %v3496_v45 = vpop.xlane.xlu1 %296 }
 0x145   :  { %v3484_v12 = vpop.xlane.xlu0 %485  ;;  %4646 = vst [vmem:[#allocation50_spill] sm:$0xff] %v3496_v45 }
 0x146   :  { %4640 = vst [vmem:[#allocation44_spill] sm:$0xff] %v3484_v12 }
 0x148   :  { %v3500_v1 = vpop.xlane.xlu1 %386 }
 0x149   :  { %v3488_v11 = vpop.xlane.xlu0 %353  ;;  %4648 = vst [vmem:[#allocation52_spill] sm:$0xff] %v3500_v1 }
 0x14a   :  { %4642 = vst [vmem:[#allocation46_spill] sm:$0xff] %v3488_v11 }
 0x14c   :  { %v3506_v12 = vpop.xlane.xlu1 %476 }
 0x14d   :  { %v3492_v47 = vpop.xlane.xlu0 %443  ;;  %4651 = vst [vmem:[#allocation55_spill] sm:$0xff] %v3506_v12 }
 0x14e   :  { %4644 = vst [vmem:[#allocation48_spill] sm:$0xff] %v3492_v47 }
 0x150   :  { %v3510_v11 = vpop.xlane.xlu1 %206 }
 0x151   :  { %v3494_v30 = vpop.xlane.xlu0 %533  ;;  %4653 = vst [vmem:[#allocation57_spill] sm:$0xff] %v3510_v11 }
 0x152   :  { %4645 = vst [vmem:[#allocation49_spill] sm:$0xff] %v3494_v30  ;;  %v3515_v30 = vshrl.u32 %v4594_v18, 7 }
 0x154   :  { %v3517_v45 = vpop.xlane.xlu1 %254  ;;  %v565_v18 = vsub.s32 2, %v3515_v30 }
 0x155   :  { %v3498_v48 = vpop.xlane.xlu0 %401  ;;  %4655 = vst [vmem:[#allocation59_spill] sm:$0xff] %v3517_v45 }
 0x156   :  { %4647 = vst [vmem:[#allocation51_spill] sm:$0xff] %v3498_v48 }
 0x158   :  { %v3523_v1 = vpop.xlane.xlu1 %344 }
 0x159   :  { %v3502_v2 = vpop.xlane.xlu0 %491  ;;  %4657 = vst [vmem:[#allocation61_spill] sm:$0xff] %v3523_v1 }
 0x15a   :  { %4649 = vst [vmem:[#allocation53_spill] sm:$0xff] %v3502_v2  ;;  %v557_v2 = vsub.s32 0, %v3515_v30 }
 0x15d   :  { %v3504_v57 = vpop.xlane.xlu0 %449 }
 0x15e   :  { %4650 = vst [vmem:[#allocation54_spill] sm:$0xff] %v3504_v57  ;;  %v561_v57 = vsub.s32 1, %v3515_v30 }
 0x161   :  { %v3508_v17 = vpop.xlane.xlu0 %539 }
 0x162   :  { %4652 = vst [vmem:[#allocation56_spill] sm:$0xff] %v3508_v17 }
 0x165   :  { %v3512_v47 = vpop.xlane.xlu0 %497 }
 0x166   :  { %4654 = vst [vmem:[#allocation58_spill] sm:$0xff] %v3512_v47 }
 0x169   :  { %v3519_v48 = vpop.xlane.xlu0 %545 }
 0x16a   :  { %4656 = vst [vmem:[#allocation60_spill] sm:$0xff] %v3519_v48 }
 0x171   :  { %v3525_v12 = vpop.permute.xlu0 %553 }
 0x172   :  { %v3528_v17 = vrot.slane %v3525_v12, %v557_v2  ;;  %v3531_v47 = vrot.slane %v3525_v12, %v561_v57  ;;  %v3542_v2 = vpop.xlane.xlu1 %434  ;;  %v3545_v57 = vrot.slane %v3525_v12, %v565_v18  ;;  %v569_v18 = vsub.s32 3, %v3515_v30 }
 0x174   :  { %v595_v45 = vmul.f32 %v3528_v17, %v3089_v20  ;;  %v596_v48 = vmul.f32 %v3528_v17, %v3101_v26  ;;  %v611_v11 = vmul.f32 %v3531_v47, %v3087_v19  ;;  %v612_v1 = vmul.f32 %v3531_v47, %v3099_v25 }
 0x175   :  { %v597_v58 = vmul.f32 %v3528_v17, %v3113_v32  ;;  %v598_v20 = vmul.f32 %v3528_v17, %v3111_v31  ;;  %v613_v19 = vmul.f32 %v3531_v47, %v3125_v38  ;;  %v614_v25 = vmul.f32 %v3531_v47, %v3123_v37 }
 0x176   :  { %v723_v22 = vpack.c.bf16 %v596_v48, %v595_v45  ;;  %v731_v40 = vpack.c.bf16 %v612_v1, %v611_v11  ;;  %v627_v32 = vmul.f32 %v3545_v57, %v3137_v44  ;;  %v628_v31 = vmul.f32 %v3545_v57, %v3135_v43 }
 0x177   :  { %v724_v1 = vpack.c.bf16 %v598_v20, %v597_v58  ;;  %v732_v48 = vpack.c.bf16 %v614_v25, %v613_v19  ;;  %v3563_v37 = vrot.slane %v3525_v12, %v569_v18  ;;  %v629_v44 = vmul.f32 %v3545_v57, %v3149_v50 }
 0x178   :  { %v875_v26 = vunpack.c.h.b16 %v723_v22  ;;  %v874_v39 = vunpack.c.l.b16 %v723_v22  ;;  %v890_v45 = vunpack.c.l.b16 %v731_v40  ;;  %v891_v11 = vunpack.c.h.b16 %v731_v40  ;;  %v3560_v22 = vpop.xlane.xlu1 %524 }
 0x179   :  { %v876_v38 = vunpack.c.l.b16 %v724_v1  ;;  %v630_v43 = vmul.f32 %v3545_v57, %v3147_v49  ;;  %v643_v19 = vmul.f32 %v3563_v37, %v3161_v56  ;;  %v644_v25 = vmul.f32 %v3563_v37, %v3159_v55 }
 0x17a   :  { %1006 = vperm.xlu1 %2675, %v875_v26   ;;  %1003 = vperm.xlu0 %2674, %v874_v39   ;;  %v892_v39 = vunpack.c.l.b16 %v732_v48  ;;  %v739_v26 = vpack.c.bf16 %v628_v31, %v627_v32  ;;  %v573_v18 = vsub.s32 4, %v3515_v30  ;;  %v600_v50 = vmul.f32 %v3528_v17, %v3171_v61 }
 0x17b   :  { %v893_v49 = vunpack.c.h.b16 %v732_v48  ;;  %v740_v32 = vpack.c.bf16 %v630_v43, %v629_v44  ;;  %v747_v31 = vpack.c.bf16 %v644_v25, %v643_v19  ;;  %v616_v61 = vmul.f32 %v3531_v47, %v3183_v3 }
 0x17c   :  { %v3565_v40 = vpop.xlane.xlu1 %302  ;;  %v906_v58 = vunpack.c.l.b16 %v739_v26  ;;  %v907_v20 = vunpack.c.h.b16 %v739_v26  ;;  %v3583_v55 = vrot.slane %v3525_v12, %v573_v18  ;;  %v645_v43 = vmul.f32 %v3563_v37, %v3197_v10 }
 0x17d   :  { %v922_v26 = vunpack.c.l.b16 %v747_v31  ;;  %v923_v48 = vunpack.c.h.b16 %v747_v31  ;;  %v909_v25 = vunpack.c.h.b16 %v740_v32  ;;  %v577_v10 = vsub.s32 5, %v3515_v30 }
 0x17e   :  { %1051 = vperm.xlu1 %2675, %v890_v45   ;;  %1054 = vperm.xlu0 %2674, %v891_v11   ;;  %v599_v45 = vmul.f32 %v3528_v17, %v3173_v62  ;;  %v877_v11 = vunpack.c.h.b16 %v724_v1  ;;  %4658 = vst [vmem:[#allocation62_spill] sm:$0xff] %v3583_v55  ;;  %v615_v62 = vmul.f32 %v3531_v47, %v3185_v4 }
 0x17f   :  { %v659_v19 = vmul.f32 %v3583_v55, %v3209_v16  ;;  %v660_v4 = vmul.f32 %v3583_v55, %v3207_v15  ;;  %v631_v16 = vmul.f32 %v3545_v57, %v3221_v24  ;;  %v632_v15 = vmul.f32 %v3545_v57, %v3219_v23 }
 0x180   :  { %v725_v56 = vpack.c.bf16 %v600_v50, %v599_v45 }
 0x181   :  { %v755_v45 = vpack.c.bf16 %v660_v4, %v659_v19 }
 0x182   :  { %1009 = vperm.xlu1 %2675, %v876_v38   ;;  %1057 = vperm.xlu0 %2674, %v892_v39   ;;  %v3580_v38 = vpop.xlane.xlu1 %392  ;;  %v908_v39 = vunpack.c.l.b16 %v740_v32  ;;  %v878_v44 = vunpack.c.l.b16 %v725_v56  ;;  %v879_v31 = vunpack.c.h.b16 %v725_v56 }
 0x186   :  { %1099 = vperm.xlu1 %2675, %v906_v58   ;;  %1102 = vperm.xlu0 %2674, %v907_v20   ;;  %v3589_v1 = vpop.xlane.xlu1 %482  ;;  %v733_v58 = vpack.c.bf16 %v616_v61, %v615_v62  ;;  %v646_v20 = vmul.f32 %v3563_v37, %v3195_v9  ;;  %v938_v9 = vunpack.c.l.b16 %v755_v45  ;;  %v661_v62 = vmul.f32 %v3583_v55, %v3233_v34 }
 0x187   :  { %v662_v61 = vmul.f32 %v3583_v55, %v3231_v33  ;;  %v601_v34 = vmul.f32 %v3528_v17, %v3257_v52  ;;  %v602_v33 = vmul.f32 %v3528_v17, %v3255_v51  ;;  %v647_v51 = vmul.f32 %v3563_v37, %v3281_v6 }
 0x188   :  { %v894_v3 = vunpack.c.l.b16 %v733_v58  ;;  %v748_v18 = vpack.c.bf16 %v646_v20, %v645_v43 }
 0x189   :  { %v756_v43 = vpack.c.bf16 %v662_v61, %v661_v62 }
 0x18a   :  { %1012 = vperm.xlu1 %2675, %v877_v11   ;;  %1060 = vperm.xlu0 %2674, %v893_v49   ;;  %v3599_v50 = vpop.xlane.xlu1 %212  ;;  %v924_v11 = vunpack.c.l.b16 %v748_v18  ;;  %v3607_v49 = vrot.slane %v3525_v12, %v577_v10  ;;  %v925_v19 = vunpack.c.h.b16 %v748_v18  ;;  %v648_v18 = vmul.f32 %v3563_v37, %v3279_v5 }
 0x18b   :  { %v940_v4 = vunpack.c.l.b16 %v756_v43 }
 0x18c   :  { %4659 = vst [vmem:[#allocation63_spill] sm:$0xff] %v3607_v49  ;;  %v675_v23 = vmul.f32 %v3607_v49, %v3245_v42  ;;  %v676_v24 = vmul.f32 %v3607_v49, %v3243_v41  ;;  %v617_v42 = vmul.f32 %v3531_v47, %v3269_v60  ;;  %v618_v41 = vmul.f32 %v3531_v47, %v3267_v59 }
 0x18e   :  { %1105 = vperm.xlu1 %2675, %v908_v39   ;;  %1147 = vperm.xlu0 %2674, %v922_v26   ;;  %v3609_v32 = vpop.xlane.xlu1 %260  ;;  %v939_v39 = vunpack.c.h.b16 %v755_v45  ;;  %v741_v26 = vpack.c.bf16 %v632_v15, %v631_v16  ;;  %v763_v20 = vpack.c.bf16 %v676_v24, %v675_v23  ;;  %v726_v45 = vpack.c.bf16 %v602_v33, %v601_v34 }
 0x18f   :  { %v734_v10 = vpack.c.bf16 %v618_v41, %v617_v42  ;;  %v677_v16 = vmul.f32 %v3607_v49, %v3293_v14  ;;  %v678_v15 = vmul.f32 %v3607_v49, %v3291_v13  ;;  %v941_v14 = vunpack.c.h.b16 %v756_v43 }
 0x190   :  { %v955_v52 = vunpack.c.h.b16 %v763_v20  ;;  %v880_v60 = vunpack.c.l.b16 %v726_v45  ;;  %v911_v6 = vunpack.c.h.b16 %v741_v26  ;;  %v881_v34 = vunpack.c.h.b16 %v726_v45 }
 0x191   :  { %v897_v33 = vunpack.c.h.b16 %v734_v10  ;;  %v664_v42 = vmul.f32 %v3583_v55, %v3336_v0 }
 0x192   :  { %1150 = vperm.xlu1 %2675, %v923_v48   ;;  %1015 = vperm.xlu0 %2674, %v878_v44   ;;  %v895_v48 = vunpack.c.h.b16 %v733_v58  ;;  %v910_v44 = vunpack.c.l.b16 %v741_v26  ;;  %v3619_v56 = vpop.xlane.xlu1 %350  ;;  %v581_v58 = vsub.s32 6, %v3515_v30 }
 0x194   :  { %v3637_v59 = vrot.slane %v3525_v12, %v581_v58 }
 0x196   :  { %1063 = vperm.xlu1 %2675, %v894_v3   ;;  %1108 = vperm.xlu0 %2674, %v909_v25   ;;  %v3630_v3 = vpop.xlane.xlu1 %440  ;;  %v954_v25 = vunpack.c.l.b16 %v763_v20  ;;  %4660 = vst [vmem:[#allocation64_spill] sm:$0xff] %v3637_v59  ;;  %v691_v62 = vmul.f32 %v3637_v59, %v3305_v28  ;;  %v692_v61 = vmul.f32 %v3637_v59, %v3303_v27 }
 0x197   :  { %v633_v20 = vmul.f32 %v3545_v57, %v3312_v36  ;;  %v634_v28 = vmul.f32 %v3545_v57, %v3320_v46  ;;  %v693_v41 = vmul.f32 %v3637_v59, %v3344_v8  ;;  %v603_v8 = vmul.f32 %v3528_v17, %v3379_v7 }
 0x198   :  { %v771_v13 = vpack.c.bf16 %v692_v61, %v691_v62  ;;  %v4663_v62 = vld [vmem:[#allocation18_spill] sm:$0xff] }
 0x199   :  { %v650_v61 = vmul.f32 %v3563_v37, %v4663_v62  ;;  %v4675_v62 = vld [vmem:[#allocation35_spill] sm:$0xff] }
 0x19a   :  { %1153 = vperm.xlu1 %2675, %v924_v11   ;;  %1195 = vperm.xlu0 %2674, %v938_v9   ;;  %v896_v11 = vunpack.c.l.b16 %v734_v10  ;;  %v749_v9 = vpack.c.bf16 %v648_v18, %v647_v51  ;;  %v970_v26 = vunpack.c.l.b16 %v771_v13 }
 0x19c   :  { %v926_v5 = vunpack.c.l.b16 %v749_v9  ;;  %v927_v46 = vunpack.c.h.b16 %v749_v9  ;;  %v4661_v9 = vld [vmem:[#allocation5_spill] sm:$0xff] }
 0x19e   :  { %1198 = vperm.xlu1 %2675, %v939_v39   ;;  %1018 = vperm.xlu0 %2674, %v879_v31   ;;  %v3643_v31 = vpop.xlane.xlu1 %530  ;;  %v764_v39 = vpack.c.bf16 %v678_v15, %v677_v16  ;;  %v620_v16 = vmul.f32 %v3531_v47, %v4661_v9 }
 0x1a0   :  { %v956_v24 = vunpack.c.l.b16 %v764_v39  ;;  %v957_v0 = vunpack.c.h.b16 %v764_v39 }
 0x1a2   :  { %1066 = vperm.xlu1 %2675, %v895_v48   ;;  %1111 = vperm.xlu0 %2674, %v910_v44   ;;  %v3649_v23 = vpop.xlane.xlu1 %308  ;;  %v585_v48 = vsub.s32 7, %v3515_v30  ;;  %v971_v44 = vunpack.c.h.b16 %v771_v13  ;;  %v4664_v13 = vld [vmem:[#allocation20_spill] sm:$0xff] }
 0x1a4   :  { %v3659_v43 = vrot.slane %v3525_v12, %v585_v48  ;;  %v694_v12 = vmul.f32 %v3637_v59, %v3355_v21  ;;  %v604_v21 = vmul.f32 %v3528_v17, %v3387_v29  ;;  %v679_v48 = vmul.f32 %v3607_v49, %v4664_v13 }
 0x1a6   :  { %1156 = vperm.xlu1 %2675, %v925_v19   ;;  %1201 = vperm.xlu0 %2674, %v940_v4   ;;  %v3656_v27 = vpop.xlane.xlu1 %398  ;;  %v742_v19 = vpack.c.bf16 %v634_v28, %v633_v20  ;;  %v663_v4 = vmul.f32 %v3583_v55, %v3328_v54  ;;  %v707_v45 = vmul.f32 %v3659_v43, %v3363_v35 }
 0x1a7   :  { %v708_v54 = vmul.f32 %v3659_v43, %v3371_v53  ;;  %v619_v53 = vmul.f32 %v3531_v47, %v3395_v63 }
 0x1a8   :  { %v912_v58 = vunpack.c.l.b16 %v742_v19 }
 0x1a9   :  { %v779_v51 = vpack.c.bf16 %v708_v54, %v707_v45  ;;  %v735_v29 = vpack.c.bf16 %v620_v16, %v619_v53  ;;  %v4669_v54 = vld [vmem:[#allocation28_spill] sm:$0xff] }
 0x1aa   :  { %1243 = vperm.xlu1 %2675, %v954_v25   ;;  %1246 = vperm.xlu0 %2674, %v955_v52   ;;  %v3665_v36 = vpop.xlane.xlu1 %488  ;;  %v757_v25 = vpack.c.bf16 %v664_v42, %v663_v4  ;;  %v772_v52 = vpack.c.bf16 %v694_v12, %v693_v41  ;;  %v4666_v4 = vld [vmem:[#allocation24_spill] sm:$0xff] }
 0x1ab   :  { %v987_v7 = vunpack.c.h.b16 %v779_v51  ;;  %v898_v63 = vunpack.c.l.b16 %v735_v29  ;;  %v709_v42 = vmul.f32 %v3659_v43, %v4666_v4  ;;  %v4672_v53 = vld [vmem:[#allocation32_spill] sm:$0xff]  ;;  %v899_v16 = vunpack.c.h.b16 %v735_v29 }
 0x1ac   :  { %v942_v10 = vunpack.c.l.b16 %v757_v25  ;;  %v972_v35 = vunpack.c.l.b16 %v772_v52  ;;  %v943_v28 = vunpack.c.h.b16 %v757_v25  ;;  %v973_v12 = vunpack.c.h.b16 %v772_v52 }
 0x1ad   :  { %v666_v9 = vmul.f32 %v3583_v55, %v4672_v53 }
 0x1ae   :  { %1021 = vperm.xlu1 %2675, %v880_v60   ;;  %1069 = vperm.xlu0 %2674, %v896_v11   ;;  %v3679_v18 = vpop.xlane.xlu1 %356  ;;  %v986_v60 = vunpack.c.l.b16 %v779_v51  ;;  %v727_v11 = vpack.c.bf16 %v604_v21, %v603_v8 }
 0x1b0   :  { %v883_v51 = vunpack.c.h.b16 %v727_v11 }
 0x1b2   :  { %1114 = vperm.xlu1 %2675, %v911_v6   ;;  %1159 = vperm.xlu0 %2674, %v926_v5   ;;  %v3685_v15 = vpop.xlane.xlu1 %446  ;;  %v882_v6 = vunpack.c.l.b16 %v727_v11  ;;  %v4662_v5 = vld [vmem:[#allocation16_spill] sm:$0xff]  ;;  %v696_v11 = vmul.f32 %v3637_v59, %v4675_v62 }
 0x1b3   :  { %v649_v39 = vmul.f32 %v3563_v37, %v4662_v5  ;;  %v4674_v5 = vld [vmem:[#allocation7_spill] sm:$0xff] }
 0x1b6   :  { %1204 = vperm.xlu1 %2675, %v941_v14   ;;  %1249 = vperm.xlu0 %2674, %v956_v24   ;;  %v913_v14 = vunpack.c.h.b16 %v742_v19  ;;  %v750_v24 = vpack.c.bf16 %v650_v61, %v649_v39  ;;  %v3695_v20 = vpop.xlane.xlu1 %536  ;;  %v695_v39 = vmul.f32 %v3637_v59, %v4674_v5 }
 0x1b8   :  { %v773_v13 = vpack.c.bf16 %v696_v11, %v695_v39  ;;  %v4687_v11 = vld [vmem:[#allocation12_spill] sm:$0xff] }
 0x1ba   :  { %1291 = vperm.xlu1 %2675, %v970_v26   ;;  %1294 = vperm.xlu0 %2674, %v971_v44   ;;  %v4665_v26 = vld [vmem:[#allocation22_spill] sm:$0xff]  ;;  %v3701_v41 = vpop.xlane.xlu1 %404 }
 0x1bb   :  { %v680_v44 = vmul.f32 %v3607_v49, %v4665_v26  ;;  %4668 = vst [vmem:[#allocation5_spill] sm:$0xff] %v3701_v41 }
 0x1be   :  { %1024 = vperm.xlu1 %2675, %v881_v34   ;;  %1072 = vperm.xlu0 %2674, %v897_v33   ;;  %v928_v34 = vunpack.c.l.b16 %v750_v24  ;;  %v765_v33 = vpack.c.bf16 %v680_v44, %v679_v48  ;;  %v3711_v52 = vpop.xlane.xlu1 %494  ;;  %v4677_v48 = vld [vmem:[#allocation8_spill] sm:$0xff]  ;;  %v4678_v44 = vld [vmem:[#allocation37_spill] sm:$0xff] }
 0x1bf   :  { %4673 = vst [vmem:[#allocation16_spill] sm:$0xff] %v3711_v52  ;;  %v605_v26 = vmul.f32 %v3528_v17, %v4677_v48  ;;  %v606_v29 = vmul.f32 %v3528_v17, %v4678_v44  ;;  %v4721_v52 = vld [vmem:[#allocation49_spill] sm:$0xff] }
 0x1c1   :  { %v728_v4 = vpack.c.bf16 %v606_v29, %v605_v26  ;;  %v975_v26 = vunpack.c.h.b16 %v773_v13 }
 0x1c2   :  { %1117 = vperm.xlu1 %2675, %v912_v58   ;;  %1162 = vperm.xlu0 %2674, %v927_v46   ;;  %v4667_v46 = vld [vmem:[#allocation26_spill] sm:$0xff]  ;;  %v958_v58 = vunpack.c.l.b16 %v765_v33  ;;  %v3717_v61 = vpop.xlane.xlu1 %452 }
 0x1c3   :  { %v710_v19 = vmul.f32 %v3659_v43, %v4667_v46  ;;  %4676 = vst [vmem:[#allocation18_spill] sm:$0xff] %v3717_v61 }
 0x1c5   :  { %v780_v45 = vpack.c.bf16 %v710_v19, %v709_v42  ;;  %v4679_v42 = vld [vmem:[#allocation9_spill] sm:$0xff]  ;;  %v4680_v19 = vld [vmem:[#allocation40_spill] sm:$0xff] }
 0x1c6   :  { %1207 = vperm.xlu1 %2675, %v942_v10   ;;  %1252 = vperm.xlu0 %2674, %v957_v0   ;;  %v635_v0 = vmul.f32 %v3545_v57, %v4669_v54  ;;  %v4670_v10 = vld [vmem:[#allocation30_spill] sm:$0xff]  ;;  %v621_v46 = vmul.f32 %v3531_v47, %v4679_v42  ;;  %v884_v54 = vunpack.c.l.b16 %v728_v4 }
 0x1c7   :  { %v636_v25 = vmul.f32 %v3545_v57, %v4670_v10  ;;  %v988_v8 = vunpack.c.l.b16 %v780_v45  ;;  %v4682_v10 = vld [vmem:[#allocation10_spill] sm:$0xff] }
 0x1c8   :  { %v4691_v42 = vld [vmem:[#allocation50_spill] sm:$0xff] }
 0x1c9   :  { %v743_v21 = vpack.c.bf16 %v636_v25, %v635_v0  ;;  %v651_v25 = vmul.f32 %v3563_v37, %v4682_v10  ;;  %v4692_v10 = vld [vmem:[#allocation14_spill] sm:$0xff] }
 0x1ca   :  { %1297 = vperm.xlu1 %2675, %v972_v35   ;;  %1339 = vperm.xlu0 %2674, %v986_v60   ;;  %v4671_v35 = vld [vmem:[#allocation6_spill] sm:$0xff] }
 0x1cb   :  { %v665_v60 = vmul.f32 %v3583_v55, %v4671_v35  ;;  %v915_v35 = vunpack.c.h.b16 %v743_v21 }
 0x1ce   :  { %1342 = vperm.xlu1 %2675, %v987_v7   ;;  %1027 = vperm.xlu0 %2674, %v882_v6   ;;  %v914_v7 = vunpack.c.l.b16 %v743_v21  ;;  %v758_v6 = vpack.c.bf16 %v666_v9, %v665_v60  ;;  %v4685_v9 = vld [vmem:[#allocation11_spill] sm:$0xff] }
 0x1d0   :  { %v945_v5 = vunpack.c.h.b16 %v758_v6 }
 0x1d2   :  { %1075 = vperm.xlu1 %2675, %v898_v63   ;;  %1120 = vperm.xlu0 %2674, %v913_v14   ;;  %v929_v14 = vunpack.c.h.b16 %v750_v24  ;;  %v944_v63 = vunpack.c.l.b16 %v758_v6  ;;  %v3727_v24 = vpop.xlane.xlu1 %542  ;;  %v638_v6 = vmul.f32 %v3545_v57, %v4691_v42 }
 0x1d3   :  { %4681 = vst [vmem:[#allocation20_spill] sm:$0xff] %v3727_v24 }
 0x1d6   :  { %1165 = vperm.xlu1 %2675, %v928_v34   ;;  %1210 = vperm.xlu0 %2674, %v943_v28   ;;  %v959_v28 = vunpack.c.h.b16 %v765_v33  ;;  %v974_v34 = vunpack.c.l.b16 %v773_v13  ;;  %v667_v13 = vmul.f32 %v3583_v55, %v4692_v10  ;;  %v4698_v10 = vld [vmem:[#allocation19_spill] sm:$0xff] }
 0x1da   :  { %1255 = vperm.xlu1 %2675, %v958_v58   ;;  %1300 = vperm.xlu0 %2674, %v973_v12   ;;  %v622_v12 = vmul.f32 %v3531_v47, %v4680_v19  ;;  %v989_v58 = vunpack.c.h.b16 %v780_v45 }
 0x1dc   :  { %v736_v0 = vpack.c.bf16 %v622_v12, %v621_v46  ;;  %v885_v12 = vunpack.c.h.b16 %v728_v4 }
 0x1de   :  { %1345 = vperm.xlu1 %2675, %v988_v8   ;;  %1030 = vperm.xlu0 %2674, %v883_v51   ;;  %v4683_v51 = vld [vmem:[#allocation42_spill] sm:$0xff]  ;;  %v3733_v8 = vpop.xlane.xlu1 %500  ;;  %v900_v60 = vunpack.c.l.b16 %v736_v0 }
 0x1df   :  { %v652_v33 = vmul.f32 %v3563_v37, %v4683_v51  ;;  %4684 = vst [vmem:[#allocation22_spill] sm:$0xff] %v3733_v8 }
 0x1e1   :  { %v751_v53 = vpack.c.bf16 %v652_v33, %v651_v25  ;;  %v4693_v25 = vld [vmem:[#allocation52_spill] sm:$0xff] }
 0x1e2   :  { %1078 = vperm.xlu1 %2675, %v899_v16   ;;  %1123 = vperm.xlu0 %2674, %v914_v7   ;;  %v681_v16 = vmul.f32 %v3607_v49, %v4685_v9  ;;  %v4686_v7 = vld [vmem:[#allocation45_spill] sm:$0xff]  ;;  %v3743_v21 = vpop.xlane.xlu1 %548  ;;  %v668_v51 = vmul.f32 %v3583_v55, %v4693_v25 }
 0x1e3   :  { %v682_v45 = vmul.f32 %v3607_v49, %v4686_v7  ;;  %v930_v39 = vunpack.c.l.b16 %v751_v53  ;;  %4689 = vst [vmem:[#allocation24_spill] sm:$0xff] %v3743_v21  ;;  %v4694_v7 = vld [vmem:[#allocation15_spill] sm:$0xff] }
 0x1e4   :  { %v697_v4 = vmul.f32 %v3637_v59, %v4694_v7 }
 0x1e5   :  { %v766_v62 = vpack.c.bf16 %v682_v45, %v681_v16  ;;  %v759_v16 = vpack.c.bf16 %v668_v51, %v667_v13  ;;  %v4695_v45 = vld [vmem:[#allocation55_spill] sm:$0xff] }
 0x1e6   :  { %1168 = vperm.xlu1 %2675, %v929_v14   ;;  %1213 = vperm.xlu0 %2674, %v944_v63   ;;  %v711_v14 = vmul.f32 %v3659_v43, %v4687_v11  ;;  %v4688_v63 = vld [vmem:[#allocation47_spill] sm:$0xff] }
 0x1e7   :  { %v712_v48 = vmul.f32 %v3659_v43, %v4688_v63  ;;  %v960_v44 = vunpack.c.l.b16 %v766_v62  ;;  %v946_v63 = vunpack.c.l.b16 %v759_v16  ;;  %v4699_v13 = vld [vmem:[#allocation59_spill] sm:$0xff] }
 0x1e8   :  { %v624_v25 = vmul.f32 %v3531_v47, %v4699_v13  ;;  %v947_v13 = vunpack.c.h.b16 %v759_v16 }
 0x1e9   :  { %v781_v29 = vpack.c.bf16 %v712_v48, %v711_v14  ;;  %v931_v14 = vunpack.c.h.b16 %v751_v53  ;;  %v623_v53 = vmul.f32 %v3531_v47, %v4698_v10 }
 0x1ea   :  { %1258 = vperm.xlu1 %2675, %v959_v28   ;;  %1303 = vperm.xlu0 %2674, %v974_v34   ;;  %v4690_v28 = vld [vmem:[#allocation13_spill] sm:$0xff] }
 0x1eb   :  { %v637_v34 = vmul.f32 %v3545_v57, %v4690_v28 }
 0x1ee   :  { %1348 = vperm.xlu1 %2675, %v989_v58   ;;  %1033 = vperm.xlu0 %2674, %v884_v54   ;;  %v990_v58 = vunpack.c.l.b16 %v781_v29  ;;  %v744_v54 = vpack.c.bf16 %v638_v6, %v637_v34  ;;  %v961_v6 = vunpack.c.h.b16 %v766_v62 }
 0x1f0   :  { %v916_v9 = vunpack.c.l.b16 %v744_v54 }
 0x1f2   :  { %1081 = vperm.xlu1 %2675, %v900_v60   ;;  %1126 = vperm.xlu0 %2674, %v915_v35   ;;  %v901_v60 = vunpack.c.h.b16 %v736_v0 }
 0x1f6   :  { %1171 = vperm.xlu1 %2675, %v930_v39   ;;  %1216 = vperm.xlu0 %2674, %v945_v5   ;;  %v698_v5 = vmul.f32 %v3637_v59, %v4695_v45  ;;  %v4700_v45 = vld [vmem:[#allocation21_spill] sm:$0xff] }
 0x1f7   :  { %v653_v62 = vmul.f32 %v3563_v37, %v4700_v45 }
 0x1f8   :  { %v774_v48 = vpack.c.bf16 %v698_v5, %v697_v4  ;;  %v737_v4 = vpack.c.bf16 %v624_v25, %v623_v53  ;;  %v4701_v5 = vld [vmem:[#allocation61_spill] sm:$0xff] }
 0x1f9   :  { %v3749_v46 = vpop.permute.xlu1 %1006  ;;  %v3751_v19 = vpop.permute.xlu0 %1003 }
 0x1fa   :  { %1261 = vperm.xlu1 %2675, %v960_v44   ;;  %1306 = vperm.xlu0 %2674, %v975_v26   ;;  %v4696_v26 = vld [vmem:[#allocation17_spill] sm:$0xff] }
 0x1fb   :  { %v607_v0 = vmul.f32 %v3528_v17, %v4696_v26  ;;  %v4697_v44 = vld [vmem:[#allocation57_spill] sm:$0xff] }
 0x1fc   :  { %v608_v28 = vmul.f32 %v3528_v17, %v4697_v44  ;;  %v902_v44 = vunpack.c.l.b16 %v737_v4 }
 0x1fd   :  { %v3757_v33 = vpop.permute.xlu1 %1051  ;;  %v3759_v35 = vpop.permute.xlu0 %1054 }
 0x1fe   :  { %1351 = vperm.xlu1 %2675, %v990_v58   ;;  %1036 = vperm.xlu0 %2674, %v885_v12   ;;  %v976_v12 = vunpack.c.l.b16 %v774_v48  ;;  %v729_v58 = vpack.c.bf16 %v608_v28, %v607_v0  ;;  %v917_v0 = vunpack.c.h.b16 %v744_v54 }
 0x200   :  { %v886_v7 = vunpack.c.l.b16 %v729_v58 }
 0x201   :  { %v3765_v39 = vpop.permute.xlu1 %1009  ;;  %v3767_v11 = vpop.permute.xlu0 %1057 }
 0x202   :  { %1084 = vperm.xlu1 %2675, %v901_v60   ;;  %1129 = vperm.xlu0 %2674, %v916_v9   ;;  %v991_v9 = vunpack.c.h.b16 %v781_v29 }
 0x205   :  { %v3773_v34 = vpop.permute.xlu1 %1099  ;;  %v3775_v42 = vpop.permute.xlu0 %1102 }
 0x206   :  { %1174 = vperm.xlu1 %2675, %v931_v14   ;;  %1219 = vperm.xlu0 %2674, %v946_v63   ;;  %v654_v14 = vmul.f32 %v3563_v37, %v4701_v5 }
 0x208   :  { %v752_v28 = vpack.c.bf16 %v654_v14, %v653_v62 }
 0x209   :  { %v3781_v51 = vpop.permute.xlu1 %1012  ;;  %v3783_v60 = vpop.permute.xlu0 %1060 }
 0x20a   :  { %1264 = vperm.xlu1 %2675, %v961_v6   ;;  %1309 = vperm.xlu0 %2674, %v976_v12   ;;  %v4702_v6 = vld [vmem:[#allocation23_spill] sm:$0xff]  ;;  %v684_v12 = vmul.f32 %v3607_v49, %v3542_v2  ;;  %v932_v25 = vunpack.c.l.b16 %v752_v28  ;;  %v977_v2 = vunpack.c.h.b16 %v774_v48 }
 0x20b   :  { %v683_v29 = vmul.f32 %v3607_v49, %v4702_v6 }
 0x20d   :  { %v3789_v63 = vpop.permute.xlu1 %1105  ;;  %v3791_v26 = vpop.permute.xlu0 %1147  ;;  %v767_v45 = vpack.c.bf16 %v684_v12, %v683_v29 }
 0x20e   :  { %1354 = vperm.xlu1 %2675, %v991_v9   ;;  %1039 = vperm.xlu0 %2674, %v886_v7   ;;  %v4703_v9 = vld [vmem:[#allocation25_spill] sm:$0xff]  ;;  %v714_v7 = vmul.f32 %v3659_v43, %v3560_v22  ;;  %v887_v22 = vunpack.c.h.b16 %v729_v58 }
 0x20f   :  { %v713_v54 = vmul.f32 %v3659_v43, %v4703_v9  ;;  %v962_v14 = vunpack.c.l.b16 %v767_v45 }
 0x211   :  { %v3797_v10 = vpop.permute.xlu1 %1150  ;;  %v3799_v53 = vpop.permute.xlu0 %1015  ;;  %v782_v6 = vpack.c.bf16 %v714_v7, %v713_v54 }
 0x212   :  { %1087 = vperm.xlu1 %2675, %v902_v44   ;;  %1132 = vperm.xlu0 %2674, %v917_v0   ;;  %v4704_v44 = vld [vmem:[#allocation27_spill] sm:$0xff]  ;;  %v640_v0 = vmul.f32 %v3545_v57, %v3565_v40  ;;  %v903_v40 = vunpack.c.h.b16 %v737_v4  ;;  %v4708_v4 = vld [vmem:[#allocation33_spill] sm:$0xff] }
 0x213   :  { %v639_v16 = vmul.f32 %v3545_v57, %v4704_v44  ;;  %v992_v9 = vunpack.c.l.b16 %v782_v6 }
 0x215   :  { %v3805_v62 = vpop.permute.xlu1 %1063  ;;  %v3807_v5 = vpop.permute.xlu0 %1108  ;;  %v745_v21 = vpack.c.bf16 %v640_v0, %v639_v16 }
 0x216   :  { %1177 = vperm.xlu1 %2675, %v932_v25   ;;  %1222 = vperm.xlu0 %2674, %v947_v13   ;;  %v4706_v25 = vld [vmem:[#allocation29_spill] sm:$0xff]  ;;  %v670_v13 = vmul.f32 %v3583_v55, %v3580_v38  ;;  %v933_v38 = vunpack.c.h.b16 %v752_v28  ;;  %v963_v28 = vunpack.c.h.b16 %v767_v45 }
 0x217   :  { %v669_v48 = vmul.f32 %v3583_v55, %v4706_v25  ;;  %v918_v44 = vunpack.c.l.b16 %v745_v21  ;;  %v609_v25 = vmul.f32 %v3528_v17, %v4708_v4  ;;  %v4710_v4 = vld [vmem:[#allocation34_spill] sm:$0xff] }
 0x219   :  { %v3813_v29 = vpop.permute.xlu1 %1153  ;;  %v3815_v12 = vpop.permute.xlu0 %1195  ;;  %v3825_v8 = vpack.c.bf16 %v670_v13, %v669_v48  ;;  %v610_v48 = vmul.f32 %v3528_v17, %v3599_v50  ;;  %v625_v17 = vmul.f32 %v3531_v47, %v4710_v4  ;;  %v656_v50 = vmul.f32 %v3563_v37, %v3619_v56 }
 0x21a   :  { %4705 = vst [vmem:[#allocation26_spill] sm:$0xff] %v3813_v29  ;;  %1267 = vperm.xlu1 %2675, %v962_v14   ;;  %1312 = vperm.xlu0 %2674, %v977_v2   ;;  %v4707_v2 = vld [vmem:[#allocation31_spill] sm:$0xff]  ;;  %v700_v14 = vmul.f32 %v3637_v59, %v3589_v1 }
 0x21b   :  { %v699_v58 = vmul.f32 %v3637_v59, %v4707_v2  ;;  %v3849_v2 = vpack.c.bf16 %v610_v48, %v609_v25  ;;  %v686_v48 = vmul.f32 %v3607_v49, %v3630_v3  ;;  %v642_v3 = vmul.f32 %v3545_v57, %v3649_v23 }
 0x21d   :  { %v3821_v54 = vpop.permute.xlu1 %1198  ;;  %v3823_v7 = vpop.permute.xlu0 %1018  ;;  %v888_v45 = vunpack.c.l.b16 %v3849_v2 }
 0x21e   :  { %1357 = vperm.xlu1 %2675, %v992_v9   ;;  %1042 = vperm.xlu0 %2674, %v887_v22   ;;  %v948_v9 = vunpack.c.l.b16 %v3825_v8  ;;  %v3836_v22 = vpack.c.bf16 %v700_v14, %v699_v58 }
 0x221   :  { %v3831_v16 = vpop.permute.xlu1 %1066  ;;  %v3833_v0 = vpop.permute.xlu0 %1111 }
 0x222   :  { %1090 = vperm.xlu1 %2675, %v903_v40   ;;  %1135 = vperm.xlu0 %2674, %v918_v44   ;;  %v626_v40 = vmul.f32 %v3531_v47, %v3609_v32  ;;  %v978_v44 = vunpack.c.l.b16 %v3836_v22  ;;  %v993_v32 = vunpack.c.h.b16 %v782_v6  ;;  %v716_v47 = vmul.f32 %v3659_v43, %v3643_v31  ;;  %v4712_v6 = vld [vmem:[#allocation38_spill] sm:$0xff] }
 0x225   :  { %v3842_v13 = vpop.permute.xlu1 %1156  ;;  %v3844_v1 = vpop.permute.xlu0 %1201 }
 0x226   :  { %4709 = vst [vmem:[#allocation28_spill] sm:$0xff] %v3842_v13  ;;  %1180 = vperm.xlu1 %2675, %v933_v38   ;;  %1225 = vperm.xlu0 %2674, %v948_v9   ;;  %v3859_v38 = vpack.c.bf16 %v626_v40, %v625_v17  ;;  %v4711_v9 = vld [vmem:[#allocation36_spill] sm:$0xff]  ;;  %v685_v40 = vmul.f32 %v3607_v49, %v4712_v6 }
 0x227   :  { %v655_v25 = vmul.f32 %v3563_v37, %v4711_v9  ;;  %v672_v17 = vmul.f32 %v3583_v55, %v3656_v27  ;;  %v4714_v9 = vlaneseq  ;;  %v702_v6 = vmul.f32 %v3637_v59, %v3665_v36  ;;  %v4717_v27 = vld [vmem:[#allocation43_spill] sm:$0xff]  ;;  %v4718_v36 = vld [vmem:[#allocation44_spill] sm:$0xff] }
 0x228   :  { %v904_v4 = vunpack.c.l.b16 %v3859_v38 }
 0x229   :  { %v3851_v58 = vpop.permute.xlu1 %1243  ;;  %v3853_v14 = vpop.permute.xlu0 %1246  ;;  %v3872_v56 = vpack.c.bf16 %v656_v50, %v655_v25  ;;  %v3884_v31 = vand.u32 127, %v4714_v9  ;;  %v3886_v50 = vpack.c.bf16 %v686_v48, %v685_v40  ;;  %v671_v9 = vmul.f32 %v3583_v55, %v4717_v27 }
 0x22a   :  { %1270 = vperm.xlu1 %2675, %v963_v28   ;;  %1315 = vperm.xlu0 %2674, %v978_v44   ;;  %v4713_v28 = vld [vmem:[#allocation39_spill] sm:$0xff]  ;;  %v701_v40 = vmul.f32 %v3637_v59, %v4718_v36  ;;  %v949_v27 = vunpack.c.h.b16 %v3825_v8 }
 0x22b   :  { %v715_v44 = vmul.f32 %v3659_v43, %v4713_v28  ;;  %v3940_v8 = vsub.s32 %v3884_v31, %v3515_v30 }
 0x22d   :  { %v3866_v24 = vpop.permute.xlu1 %1021  ;;  %v3868_v61 = vpop.permute.xlu0 %1069  ;;  %v3897_v41 = vpack.c.bf16 %v716_v47, %v715_v44  ;;  %v1392_v44 = vadd.s32 4294967288, %v3884_v31 }
 0x22e   :  { %1360 = vperm.xlu1 %2675, %v993_v32   ;;  %1045 = vperm.xlu0 %2674, %v888_v45   ;;  %v919_v32 = vunpack.c.h.b16 %v745_v21  ;;  %v4715_v45 = vld [vmem:[#allocation41_spill] sm:$0xff]  ;;  %v934_v21 = vunpack.c.l.b16 %v3872_v56 }
 0x22f   :  { %v641_v25 = vmul.f32 %v3545_v57, %v4715_v45  ;;  %v3907_v45 = vpack.c.bf16 %v672_v17, %v671_v9  ;;  %v994_v9 = vunpack.c.l.b16 %v3897_v41  ;;  %v3936_v59 = vsub.s32 %v1392_v44, %v3515_v30 }
 0x230   :  { %v718_v44 = vmul.f32 %v3659_v43, %v3695_v20  ;;  %v1427_v20 = vadd.s32 4294967248, %v3884_v31 }
 0x231   :  { %v3892_v28 = vpop.permute.xlu1 %1114  ;;  %v3894_v23 = vpop.permute.xlu0 %1159  ;;  %v3903_v48 = vpack.c.bf16 %v642_v3, %v641_v25  ;;  %v658_v3 = vmul.f32 %v3563_v37, %v3679_v18  ;;  %v4720_v25 = vld [vmem:[#allocation48_spill] sm:$0xff] }
 0x232   :  { %4716 = vst [vmem:[#allocation30_spill] sm:$0xff] %v3894_v23  ;;  %1093 = vperm.xlu1 %2675, %v904_v4   ;;  %1138 = vperm.xlu0 %2674, %v919_v32   ;;  %v4719_v23 = vld [vmem:[#allocation46_spill] sm:$0xff]  ;;  %v964_v4 = vunpack.c.l.b16 %v3886_v50  ;;  %v3914_v32 = vpack.c.bf16 %v702_v6, %v701_v40  ;;  %v687_v57 = vmul.f32 %v3607_v49, %v4720_v25  ;;  %v1399_v25 = vadd.s32 4294967280, %v3884_v31 }
 0x233   :  { %v657_v47 = vmul.f32 %v3563_v37, %v4719_v23  ;;  %v717_v6 = vmul.f32 %v3659_v43, %v4721_v52  ;;  %v920_v37 = vunpack.c.l.b16 %v3903_v48  ;;  %v688_v40 = vmul.f32 %v3607_v49, %v3685_v15 }
 0x234   :  { %v979_v52 = vunpack.c.h.b16 %v3836_v22  ;;  %v1406_v23 = vadd.s32 4294967272, %v3884_v31  ;;  %v3956_v18 = vsub.s32 %v1399_v25, %v3515_v30 }
 0x235   :  { %v3920_v36 = vpop.permute.xlu1 %1204  ;;  %v3922_v17 = vpop.permute.xlu0 %1249  ;;  %v3946_v15 = vpack.c.bf16 %v658_v3, %v657_v47  ;;  %v3953_v22 = vpack.c.bf16 %v688_v40, %v687_v57  ;;  %v1413_v47 = vadd.s32 4294967264, %v3884_v31  ;;  %v1420_v3 = vadd.s32 4294967256, %v3884_v31 }
 0x236   :  { %1183 = vperm.xlu1 %2675, %v934_v21   ;;  %1228 = vperm.xlu0 %2674, %v949_v27   ;;  %v1391_v57 = vrot.slane %v3751_v19, %v3940_v8  ;;  %v3975_v27 = vpack.c.bf16 %v718_v44, %v717_v6  ;;  %v1504_v19 = vrot.slane %v3759_v35, %v3936_v59 }
 0x237   :  { %v3992_v6 = vsub.s32 %v1420_v3, %v3515_v30  ;;  %v1746_v35 = vrot.slane %v3844_v1, %v3956_v18  ;;  %v1737_v3 = vrot.slane %v3815_v12, %v3940_v8  ;;  %v4722_v1 = vunpack.c.h.b16 %v3859_v38 }
 0x238   :  { %v1825_v12 = vrot.slane %v3922_v17, %v3956_v18  ;;  %v1583_v38 = vrot.slane %v3775_v42, %v3936_v59 }
 0x239   :  { %v1292_v49 = vpop.permute.xlu1 %1291  ;;  %v1295_v55 = vpop.permute.xlu0 %1294 }
 0x23a   :  { %v1895_v13 = vrot.slane %v1292_v49, %v3940_v8  ;;  %v1899_v29 = vrot.slane %v1295_v55, %v3936_v59  ;;  %1273 = vperm.xlu1 %2675, %v964_v4   ;;  %1318 = vperm.xlu0 %2674, %v979_v52   ;;  %v889_v49 = vunpack.c.h.b16 %v3849_v2  ;;  %v1396_v55 = vrot.slane %v3749_v46, %v3936_v59 }
 0x23b   :  { %v1434_v4 = vadd.s32 4294967240, %v3884_v31  ;;  %v1441_v52 = vadd.s32 4294967232, %v3884_v31  ;;  %v1500_v46 = vrot.slane %v3757_v33, %v3940_v8  ;;  %v1403_v2 = vrot.slane %v3765_v39, %v3956_v18 }
 0x23c   :  { %v3962_v21 = vsel %vm1397_vm1, %v1899_v29, %v1895_v13  ;;  %v3978_v29 = vsub.s32 %v1406_v23, %v3515_v30  ;;  %v3985_v13 = vsub.s32 %v1413_v47, %v3515_v30  ;;  %v1741_v23 = vrot.slane %v3821_v54, %v3936_v59 }
 0x23d   :  { %v3970_v40 = vpop.permute.xlu1 %1024  ;;  %v3972_v25 = vpop.permute.xlu0 %1072  ;;  %v1398_v33 = vsel %vm1397_vm1, %v1396_v55, %v1391_v57  ;;  %v4001_v44 = vsub.s32 %v1434_v4, %v3515_v30  ;;  %v4008_v54 = vsub.s32 %v1441_v52, %v3515_v30  ;;  %v1505_v55 = vsel %vm1397_vm1, %v1504_v19, %v1500_v46 }
 0x23e   :  { %1363 = vperm.xlu1 %2675, %v994_v9   ;;  %1048 = vperm.xlu0 %2674, %v889_v49   ;;  %v3995_v9 = vsub.s32 %v1427_v20, %v3515_v30  ;;  %v1816_v20 = vrot.slane %v3851_v58, %v3940_v8  ;;  %v1820_v49 = vrot.slane %v3853_v14, %v3936_v59 }
 0x23f   :  { %v1509_v57 = vrot.slane %v3767_v11, %v3956_v18  ;;  %v1751_v4 = vrot.slane %v3920_v36, %v3978_v29  ;;  %v1405_v58 = vsel %vm1404_vm2, %v1403_v2, %v1398_v33  ;;  %v1579_v14 = vrot.slane %v3773_v34, %v3940_v8 }
 0x240   :  { %v1410_v52 = vrot.slane %v3781_v51, %v3978_v29  ;;  %v1514_v11 = vrot.slane %v3783_v60, %v3978_v29  ;;  %v1588_v36 = vrot.slane %v3789_v63, %v3956_v18  ;;  %v1821_v34 = vsel %vm1397_vm1, %v1820_v49, %v1816_v20 }
 0x241   :  { %v4003_v47 = vpop.permute.xlu1 %1117  ;;  %v4005_v39 = vpop.permute.xlu0 %1162  ;;  %v4724_v51 = vunpack.c.l.b16 %v3907_v45  ;;  %v1510_v60 = vsel %vm1404_vm2, %v1509_v57, %v1505_v55  ;;  %v1417_v63 = vrot.slane %v3799_v53, %v3985_v13  ;;  %v1424_v20 = vrot.slane %v3823_v7, %v3992_v6 }
 0x242   :  { %1096 = vperm.xlu1 %2675, %v4722_v1   ;;  %1141 = vperm.xlu0 %2674, %v920_v37   ;;  %v1742_v37 = vsel %vm1397_vm1, %v1741_v23, %v1737_v3  ;;  %v4723_v23 = vunpack.c.h.b16 %v3872_v56  ;;  %v1519_v3 = vrot.slane %v3805_v62, %v3985_v13  ;;  %v1584_v1 = vsel %vm1397_vm1, %v1583_v38, %v1579_v14 }
 0x243   :  { %v1747_v17 = vsel %vm1404_vm2, %v1746_v35, %v1742_v37  ;;  %v1826_v35 = vsel %vm1404_vm2, %v1825_v12, %v1821_v34  ;;  %v1412_v53 = vsel %vm1411_vm3, %v1410_v52, %v1405_v58  ;;  %v1515_v55 = vsel %vm1411_vm3, %v1514_v11, %v1510_v60 }
 0x244   :  { %v1752_v33 = vsel %vm1411_vm3, %v1751_v4, %v1747_v17  ;;  %v1431_v57 = vrot.slane %v3866_v24, %v3995_v9  ;;  %v1589_v12 = vsel %vm1404_vm2, %v1588_v36, %v1584_v1  ;;  %v1658_v7 = vrot.slane %v3791_v26, %v3940_v8 }
 0x245   :  { %v1208_v46 = vpop.permute.xlu1 %1207  ;;  %v1253_v19 = vpop.permute.xlu0 %1252  ;;  %v4725_v17 = vunpack.c.h.b16 %v3886_v50  ;;  %v4726_v14 = vunpack.c.l.b16 %v3914_v32  ;;  %v1662_v58 = vrot.slane %v3797_v10, %v3936_v59  ;;  %v1419_v24 = vsel %vm1418_vm4, %v1417_v63, %v1412_v53 }
 0x246   :  { %v1756_v42 = vrot.slane %v1208_v46, %v3985_v13  ;;  %v1830_v2 = vrot.slane %v1253_v19, %v3978_v29  ;;  %1186 = vperm.xlu1 %2675, %v4723_v23   ;;  %1231 = vperm.xlu0 %2674, %v4724_v51   ;;  %v1593_v38 = vrot.slane %v3807_v5, %v3978_v29  ;;  %v4728_v23 = vunpack.c.h.b16 %v3903_v48 }
 0x247   :  { %v1438_v26 = vrot.slane %v3970_v40, %v4001_v44  ;;  %v1520_v52 = vsel %vm1418_vm4, %v1519_v3, %v1515_v55  ;;  %v1426_v50 = vsel %vm1425_vm5, %v1424_v20, %v1419_v24  ;;  %v1524_v11 = vrot.slane %v3831_v16, %v3992_v6 }
 0x248   :  { %v4055_v56 = vsel %vm1418_vm4, %v1756_v42, %v1752_v33  ;;  %v4058_v49 = vsel %vm1411_vm3, %v1830_v2, %v1826_v35  ;;  %v1598_v10 = vrot.slane %v3833_v0, %v3985_v13  ;;  %v1433_v46 = vsel %vm1432_vm6, %v1431_v57, %v1426_v50  ;;  %v4730_v35 = vld [vmem:[#allocation28_spill] sm:$0xff] }
 0x249   :  { %v1298_v4 = vpop.permute.xlu1 %1297  ;;  %v1340_v62 = vpop.permute.xlu0 %1339  ;;  %v1529_v5 = vrot.slane %v3868_v61, %v3995_v9  ;;  %v1603_v40 = vrot.slane %v3892_v28, %v3992_v6  ;;  %v936_v42 = vunpack.c.l.b16 %v3946_v15  ;;  %v4727_v0 = vunpack.c.h.b16 %v3897_v41 }
 0x24a   :  { %v1904_v37 = vrot.slane %v1298_v4, %v3956_v18  ;;  %1276 = vperm.xlu1 %2675, %v4725_v17   ;;  %1321 = vperm.xlu0 %2674, %v4726_v14   ;;  %v1974_v16 = vrot.slane %v1340_v62, %v3940_v8  ;;  %v1594_v61 = vsel %vm1411_vm3, %v1593_v38, %v1589_v12  ;;  %v966_v55 = vunpack.c.l.b16 %v3953_v22  ;;  %v4733_v38 = vld [vmem:[#allocation5_spill] sm:$0xff] }
 0x24b   :  { %v1440_v28 = vsel %vm1439_vm7, %v1438_v26, %v1433_v46  ;;  %v1534_v51 = vrot.slane %v3972_v25, %v4001_v44  ;;  %v1608_v8 = vrot.slane %v4003_v47, %v3995_v9  ;;  %v1525_v63 = vsel %vm1425_vm5, %v1524_v11, %v1520_v52  ;;  %v4731_v47 = vld [vmem:[#allocation30_spill] sm:$0xff] }
 0x24c   :  { %v4086_v36 = vsel %vm1404_vm2, %v1904_v37, %v3962_v21  ;;  %v1599_v33 = vsel %vm1418_vm4, %v1598_v10, %v1594_v61  ;;  %v1672_v3 = vrot.slane %v4730_v35, %v3978_v29  ;;  %v1530_v25 = vsel %vm1432_vm6, %v1529_v5, %v1525_v63  ;;  %v4734_v26 = vld [vmem:[#allocation62_spill] sm:$0xff]  ;;  %v4735_v10 = vld [vmem:[#allocation51_spill] sm:$0xff]  ;;  %v4738_v61 = vld [vmem:[#allocation64_spill] sm:$0xff] }
 0x24d   :  { %v1343_v19 = vpop.permute.xlu1 %1342  ;;  %v1028_v34 = vpop.permute.xlu0 %1027  ;;  %v1677_v20 = vrot.slane %v4731_v47, %v3985_v13  ;;  %v1604_v57 = vsel %vm1425_vm5, %v1603_v40, %v1599_v33  ;;  %v4732_v12 = vunpack.c.h.b16 %v3907_v45  ;;  %v1663_v37 = vsel %vm1397_vm1, %v1662_v58, %v1658_v7  ;;  %v4741_v47 = vld [vmem:[#allocation63_spill] sm:$0xff] }
 0x24e   :  { %v1978_v21 = vrot.slane %v1343_v19, %v3936_v59  ;;  %v1445_v2 = vrot.slane %v1028_v34, %v4008_v54  ;;  %1366 = vperm.xlu1 %2675, %v4727_v0   ;;  %1144 = vperm.xlu0 %2674, %v4728_v23   ;;  %v4729_v59 = vld [vmem:[#allocation26_spill] sm:$0xff]  ;;  %v1535_v17 = vsel %vm1439_vm7, %v1534_v51, %v1530_v25  ;;  %v4736_v34 = vunpack.c.h.b16 %v3914_v32  ;;  %v4737_v23 = vld [vmem:[#allocation16_spill] sm:$0xff]  ;;  %v4739_v32 = vld [vmem:[#allocation53_spill] sm:$0xff] }
 0x24f   :  { %v1667_v60 = vrot.slane %v4729_v59, %v3956_v18  ;;  %v1609_v14 = vsel %vm1432_vm6, %v1608_v8, %v1604_v57  ;;  %v1682_v24 = vrot.slane %v4005_v39, %v3992_v6  ;;  %v674_v52 = vmul.f32 %v4734_v26, %v4733_v38  ;;  %v4740_v25 = vld [vmem:[#allocation18_spill] sm:$0xff] }
 0x250   :  { %v4113_v41 = vsel %vm1397_vm1, %v1978_v21, %v1974_v16  ;;  %v4116_v48 = vsel %vm1446_vm8, %v1445_v2, %v1440_v28  ;;  %v673_v7 = vmul.f32 %v4734_v26, %v4735_v10  ;;  %v937_v16 = vunpack.c.h.b16 %v3946_v15  ;;  %v4742_v57 = vld [vmem:[#allocation54_spill] sm:$0xff]  ;;  %v4744_v10 = vld [vmem:[#allocation56_spill] sm:$0xff] }
 0x251   :  { %v1076_v1 = vpop.permute.xlu1 %1075  ;;  %v1121_v53 = vpop.permute.xlu0 %1120  ;;  %v1668_v50 = vsel %vm1404_vm2, %v1667_v60, %v1663_v37  ;;  %v996_v21 = vunpack.c.l.b16 %v3975_v27  ;;  %v704_v28 = vmul.f32 %v4738_v61, %v4737_v23  ;;  %v703_v59 = vmul.f32 %v4738_v61, %v4739_v32 }
 0x252   :  { %v1539_v4 = vrot.slane %v1076_v1, %v4008_v54  ;;  %v1613_v62 = vrot.slane %v1121_v53, %v4001_v44  ;;  %1189 = vperm.xlu1 %2675, %v936_v42   ;;  %1234 = vperm.xlu0 %2674, %v4732_v12   ;;  %v1673_v58 = vsel %vm1411_vm3, %v1672_v3, %v1668_v50  ;;  %v1448_v42 = vadd.s32 4294967224, %v3884_v31 }
 0x253   :  { %v1678_v39 = vsel %vm1418_vm4, %v1677_v20, %v1673_v58  ;;  %v762_v0 = vpack.c.bf16 %v674_v52, %v673_v7  ;;  %v967_v3 = vunpack.c.h.b16 %v3953_v22  ;;  %v777_v1 = vpack.c.bf16 %v704_v28, %v703_v59 }
 0x254   :  { %v4139_v11 = vsel %vm1446_vm8, %v1539_v4, %v1535_v17  ;;  %v4142_v45 = vsel %vm1439_vm7, %v1613_v62, %v1609_v14  ;;  %v1683_v2 = vsel %vm1425_vm5, %v1682_v24, %v1678_v39  ;;  %v4170_v35 = vsub.s32 %v1448_v42, %v3515_v30  ;;  %v4743_v24 = vld [vmem:[#allocation20_spill] sm:$0xff]  ;;  %v4745_v39 = vld [vmem:[#allocation22_spill] sm:$0xff]  ;;  %v2677_v42 = vld [vmem:[%s4585_s2 + $0x8] sm:$0xff]  }
 0x255   :  { %v1166_v46 = vpop.permute.xlu1 %1165  ;;  %v1211_v5 = vpop.permute.xlu0 %1210  ;;  %v952_v20 = vunpack.c.l.b16 %v762_v0  ;;  %v689_v4 = vmul.f32 %v4741_v47, %v4742_v57  ;;  %v997_v17 = vunpack.c.h.b16 %v3975_v27  ;;  %v2733_v14 = vmov 0.0   ;;  %v2676_v27 = vld [vmem:[%s4585_s2] sm:$0xff]  }
 0x256   :  { %v1687_v40 = vrot.slane %v1166_v46, %v3995_v9  ;;  %v1761_v19 = vrot.slane %v1211_v5, %v3992_v6  ;;  %1279 = vperm.xlu1 %2675, %v966_v55   ;;  %1324 = vperm.xlu0 %2674, %v4736_v34   ;;  %v720_v38 = vmul.f32 %v3659_v43, %v4743_v24  ;;  %vm2050_vm1 = vcmask 1041409  }
 0x257   :  { %2588 = vmatprep.subr.bf16.mxu0 %v2733_v14  ;;  %2608 = vmatprep.subr.bf16.mxu1 %v2733_v14  ;;  %v719_v7 = vmul.f32 %v3659_v43, %v4744_v10 }
 0x258   :  { %v4159_v51 = vsel %vm1432_vm6, %v1687_v40, %v1683_v2  ;;  %v4163_v8 = vsel %vm1425_vm5, %v1761_v19, %v4055_v56  ;;  %v690_v56 = vmul.f32 %v4741_v47, %v4740_v25  ;;  %2589 = vmatpush3.bf16.msra.mxu0 %v2676_v27  ;;  %v706_v40 = vmul.f32 %v4738_v61, %v4745_v39  ;;  %v4746_v2 = vld [vmem:[#allocation58_spill] sm:$0xff] }
 0x259   :  { %v1256_v60 = vpop.permute.xlu1 %1255  ;;  %v1301_v15 = vpop.permute.xlu0 %1300  ;;  %2590 = vmatprep.subr.bf16.mxu0 %v2733_v14  ;;  %v1462_v39 = vadd.s32 4294967208, %v3884_v31  ;;  %2604 = vmatprep.mubr.msk.bf16.mxu0 %vm2734_vm11, %v2733_v14 }
 0x25a   :  { %v1835_v63 = vrot.slane %v1256_v60, %v3985_v13  ;;  %v1909_v33 = vrot.slane %v1301_v15, %v3978_v29  ;;  %1369 = vperm.xlu1 %2675, %v996_v21   ;;  %1192 = vperm.xlu0 %2674, %v937_v16  }
 0x25b   :  { %2624 = vmatprep.mubr.msk.bf16.mxu1 %vm2734_vm11, %v2733_v14 }
 0x25c   :  { %v4177_v53 = vsel %vm1418_vm4, %v1835_v63, %v4058_v49  ;;  %v4181_v55 = vsel %vm1411_vm3, %v1909_v33, %v4086_v36  ;;  %v770_v49 = vpack.c.bf16 %v690_v56, %v689_v4  ;;  %v982_v36 = vunpack.c.l.b16 %v777_v1  ;;  %2591 = vmatpush3.bf16.msra.mxu0 %v2677_v42  ;;  %v2678_v33 = vld [vmem:[%s4585_s2 + $0x10] sm:$0xff]   ;;  %v4747_v56 = vld [vmem:[#allocation24_spill] sm:$0xff]  ;;  %v2679_v4 = vld [vmem:[%s4585_s2 + $0x18] sm:$0xff]  }
 0x25d   :  { %v1346_v62 = vpop.permute.xlu1 %1345  ;;  %v1031_v12 = vpop.permute.xlu0 %1030  ;;  %2592 = vmatprep.subr.bf16.mxu0 %v2733_v14 }
 0x25e   :  { %v1983_v22 = vrot.slane %v1346_v62, %v3956_v18  ;;  %v1452_v37 = vrot.slane %v1031_v12, %v4170_v35  ;;  %1237 = vperm.xlu1 %2675, %v952_v20   ;;  %1282 = vperm.xlu0 %2674, %v967_v3   ;;  %v968_v5 = vunpack.c.l.b16 %v770_v49  ;;  %v722_v20 = vmul.f32 %v3659_v43, %v4747_v56 }
 0x260   :  { %v4194_v26 = vsel %vm1404_vm2, %v1983_v22, %v4113_v41  ;;  %v4198_v18 = vsel %vm1453_vm9, %v1452_v37, %v4116_v48  ;;  %v953_v41 = vunpack.c.h.b16 %v762_v0  ;;  %v785_v48 = vpack.c.bf16 %v720_v38, %v719_v7  ;;  %2593 = vmatpush3.bf16.msra.mxu0 %v2678_v33  ;;  %v4748_v22 = vld [vmem:[#allocation60_spill] sm:$0xff] }
 0x261   :  { %v1079_v52 = vpop.permute.xlu1 %1078  ;;  %v1124_v50 = vpop.permute.xlu0 %1123  ;;  %v705_v0 = vmul.f32 %v4738_v61, %v4746_v2  ;;  %2594 = vmatprep.subr.bf16.mxu0 %v2733_v14  ;;  %v721_v37 = vmul.f32 %v3659_v43, %v4748_v22  ;;  %v2687_v22 = vld [vmem:[%s4587_s4 + $0x18] sm:$0xff]   ;;  %vm2052_vm2 = vcmask 1042434  }
 0x262   :  { %v1544_v58 = vrot.slane %v1079_v52, %v4170_v35  ;;  %v1618_v46 = vrot.slane %v1124_v50, %v4008_v54  ;;  %1327 = vperm.xlu1 %2675, %v982_v36   ;;  %1372 = vperm.xlu0 %2674, %v997_v17   ;;  %v998_v32 = vunpack.c.l.b16 %v785_v48 }
 0x263   :  { %v778_v59 = vpack.c.bf16 %v706_v40, %v705_v0  ;;  %v786_v36 = vpack.c.bf16 %v722_v20, %v721_v37  ;;  %v4277_v0 = vsub.s32 %v1462_v39, %v3515_v30 }
 0x264   :  { %v1545_v19 = vsel %vm1453_vm9, %v1544_v58, %v4139_v11  ;;  %v1619_v34 = vsel %vm1446_vm8, %v1618_v46, %v4142_v45  ;;  %v1455_v11 = vadd.s32 4294967216, %v3884_v31  ;;  %v983_v45 = vunpack.c.h.b16 %v777_v1  ;;  %2595 = vmatpush3.bf16.msra.mxu0 %v2679_v4  ;;  %v2681_v58 = vld [vmem:[%s4585_s2 + $0x28] sm:$0xff]  }
 0x265   :  { %v1169_v16 = vpop.permute.xlu1 %1168  ;;  %v1214_v21 = vpop.permute.xlu0 %1213  ;;  %2596 = vmatprep.subr.bf16.mxu0 %v2733_v14  ;;  %v1000_v10 = vunpack.c.l.b16 %v786_v36 }
 0x266   :  { %v1692_v23 = vrot.slane %v1169_v16, %v4001_v44  ;;  %v1766_v28 = vrot.slane %v1214_v21, %v3995_v9  ;;  %1240 = vperm.xlu1 %2675, %v953_v41   ;;  %1285 = vperm.xlu0 %2674, %v968_v5   ;;  %v4233_v47 = vsub.s32 %v1455_v11, %v3515_v30  ;;  %v2682_v16 = vld [vmem:[%s4585_s2 + $0x30] sm:$0xff]  }
 0x268   :  { %v1693_v60 = vsel %vm1439_vm7, %v1692_v23, %v4159_v51  ;;  %v1767_v15 = vsel %vm1432_vm6, %v1766_v28, %v4163_v8  ;;  %v969_v51 = vunpack.c.h.b16 %v770_v49  ;;  %v984_v8 = vunpack.c.l.b16 %v778_v59  ;;  %v2683_v23 = vld [vmem:[%s4585_s2 + $0x38] sm:$0xff]  }
 0x269   :  { %v1259_v61 = vpop.permute.xlu1 %1258  ;;  %v1304_v63 = vpop.permute.xlu0 %1303 }
 0x26a   :  { %v1840_v3 = vrot.slane %v1259_v61, %v3992_v6  ;;  %v1914_v25 = vrot.slane %v1304_v63, %v3985_v13  ;;  %1330 = vperm.xlu1 %2675, %v983_v45   ;;  %1375 = vperm.xlu0 %2674, %v998_v32   ;;  %v2685_v61 = vld [vmem:[%s4587_s4 + $0x8] sm:$0xff]  }
 0x26c   :  { %v1841_v1 = vsel %vm1425_vm5, %v1840_v3, %v4177_v53  ;;  %v1915_v57 = vsel %vm1418_vm4, %v1914_v25, %v4181_v55  ;;  %v999_v53 = vunpack.c.h.b16 %v785_v48  ;;  %v985_v55 = vunpack.c.h.b16 %v778_v59  ;;  %v2684_v59 = vld [vmem:[%s4587_s4] sm:$0xff]  }
 0x26d   :  { %v1349_v62 = vpop.permute.xlu1 %1348  ;;  %v1034_v12 = vpop.permute.xlu0 %1033  ;;  %2609 = vmatpush3.bf16.msra.mxu1 %v2684_v59 }
 0x26e   :  { %v1988_v17 = vrot.slane %v1349_v62, %v3978_v29  ;;  %v1459_v49 = vrot.slane %v1034_v12, %v4233_v47  ;;  %1288 = vperm.xlu1 %2675, %v969_v51   ;;  %1333 = vperm.xlu0 %2674, %v984_v8   ;;  %v2680_v29 = vld [vmem:[%s4585_s2 + $0x20] sm:$0xff]   ;;  %v2686_v8 = vld [vmem:[%s4587_s4 + $0x10] sm:$0xff]   ;;  %v1469_v12 = vadd.s32 4294967200, %v3884_v31 }
 0x26f   :  { %2597 = vmatpush3.bf16.msra.mxu0 %v2680_v29  ;;  %2610 = vmatprep.subr.bf16.mxu1 %v2733_v14 }
 0x270   :  { %v1989_v24 = vsel %vm1411_vm3, %v1988_v17, %v4194_v26  ;;  %v1461_v38 = vsel %vm1460_vm10, %v1459_v49, %v4198_v18  ;;  %v1001_v26 = vunpack.c.h.b16 %v786_v36  ;;  %2598 = vmatprep.subr.bf16.mxu0 %v2733_v14  ;;  %vm2054_vm3 = vcmask 1043459  }
 0x271   :  { %v1082_v27 = vpop.permute.xlu1 %1081  ;;  %v1127_v43 = vpop.permute.xlu0 %1126  ;;  %2611 = vmatpush3.bf16.msra.mxu1 %v2685_v61 }
 0x272   :  { %v1549_v52 = vrot.slane %v1082_v27, %v4233_v47  ;;  %v1623_v50 = vrot.slane %v1127_v43, %v4170_v35  ;;  %1378 = vperm.xlu1 %2675, %v999_v53   ;;  %1336 = vperm.xlu0 %2674, %v985_v55  }
 0x273   :  { %2599 = vmatpush3.bf16.msra.mxu0 %v2681_v58  ;;  %2612 = vmatprep.subr.bf16.mxu1 %v2733_v14 }
 0x274   :  { %v1550_v7 = vsel %vm1460_vm10, %v1549_v52, %v1545_v19  ;;  %v1624_v18 = vsel %vm1453_vm9, %v1623_v50, %v1619_v34  ;;  %2600 = vmatprep.subr.bf16.mxu0 %v2733_v14 }
 0x275   :  { %v1172_v46 = vpop.permute.xlu1 %1171  ;;  %v1217_v41 = vpop.permute.xlu0 %1216  ;;  %2613 = vmatpush3.bf16.msra.mxu1 %v2686_v8 }
 0x276   :  { %v1697_v5 = vrot.slane %v1172_v46, %v4008_v54  ;;  %v1771_v48 = vrot.slane %v1217_v41, %v4001_v44  ;;  %1381 = vperm.xlu1 %2675, %v1000_v10   ;;  %1384 = vperm.xlu0 %2674, %v1001_v26   ;;  %v2689_v26 = vld [vmem:[%s4587_s4 + $0x28] sm:$0xff]  }
 0x277   :  { %2601 = vmatpush3.bf16.msra.mxu0 %v2682_v16  ;;  %2614 = vmatprep.subr.bf16.mxu1 %v2733_v14 }
 0x278   :  { %v1698_v40 = vsel %vm1446_vm8, %v1697_v5, %v1693_v60  ;;  %v1772_v19 = vsel %vm1439_vm7, %v1771_v48, %v1767_v15  ;;  %2602 = vmatprep.subr.bf16.mxu0 %v2733_v14 }
 0x279   :  { %v1262_v34 = vpop.permute.xlu1 %1261  ;;  %v1307_v42 = vpop.permute.xlu0 %1306  ;;  %2615 = vmatpush3.bf16.msra.mxu1 %v2687_v22 }
 0x27a   :  { %v1845_v21 = vrot.slane %v1262_v34, %v3995_v9  ;;  %v1919_v2 = vrot.slane %v1307_v42, %v3992_v6  ;;  %2616 = vmatprep.subr.bf16.mxu1 %v2733_v14  ;;  %v1476_v42 = vadd.s32 4294967192, %v3884_v31 }
 0x27b   :  { %2603 = vmatpush3.bf16.msra.mxu0 %v2683_v23 }
 0x27c   :  { %v1846_v28 = vsel %vm1432_vm6, %v1845_v21, %v1841_v1  ;;  %v1920_v11 = vsel %vm1425_vm5, %v1919_v2, %v1915_v57  ;;  %2628 = vmatprep.subr.bf16.mxu0 %v2733_v14 }
 0x27d   :  { %v1352_v45 = vpop.permute.xlu1 %1351  ;;  %v1037_v32 = vpop.permute.xlu0 %1036 }
 0x27e   :  { %v1993_v60 = vrot.slane %v1352_v45, %v3985_v13  ;;  %v1466_v15 = vrot.slane %v1037_v32, %v4277_v0  ;;  %v4350_v45 = vsub.s32 %v1476_v42, %v3515_v30 }
 0x280   :  { %v1994_v63 = vsel %vm1418_vm4, %v1993_v60, %v1989_v24  ;;  %v1468_v33 = vsel %vm1467_vm12, %v1466_v15, %v1461_v38  ;;  %v4321_v24 = vsub.s32 %v1469_v12, %v3515_v30  ;;  %v2688_v38 = vld [vmem:[%s4587_s4 + $0x20] sm:$0xff]   ;;  %vm2056_vm4 = vcmask 1044484  }
 0x281   :  { %v1085_v3 = vpop.permute.xlu1 %1084  ;;  %v1130_v25 = vpop.permute.xlu0 %1129  ;;  %2617 = vmatpush3.bf16.msra.mxu1 %v2688_v38 }
 0x282   :  { %v1554_v13 = vrot.slane %v1085_v3, %v4277_v0  ;;  %v1628_v51 = vrot.slane %v1130_v25, %v4233_v47  ;;  %2618 = vmatprep.subr.bf16.mxu1 %v2733_v14 }
 0x284   :  { %v1555_v56 = vsel %vm1467_vm12, %v1554_v13, %v1550_v7  ;;  %v1629_v20 = vsel %vm1460_vm10, %v1628_v51, %v1624_v18 }
 0x285   :  { %v1175_v1 = vpop.permute.xlu1 %1174  ;;  %v1220_v57 = vpop.permute.xlu0 %1219  ;;  %2619 = vmatpush3.bf16.msra.mxu1 %v2689_v26 }
 0x286   :  { %v1702_v4 = vrot.slane %v1175_v1, %v4170_v35  ;;  %v1776_v62 = vrot.slane %v1220_v57, %v4008_v54  ;;  %2620 = vmatprep.subr.bf16.mxu1 %v2733_v14 }
 0x288   :  { %v1703_v37 = vsel %vm1453_vm9, %v1702_v4, %v1698_v40  ;;  %v1777_v17 = vsel %vm1446_vm8, %v1776_v62, %v1772_v19  ;;  %v1483_v62 = vadd.s32 4294967184, %v3884_v31 }
 0x289   :  { %v1265_v49 = vpop.permute.xlu1 %1264  ;;  %v1310_v53 = vpop.permute.xlu0 %1309 }
 0x28a   :  { %v1850_v55 = vrot.slane %v1265_v49, %v4001_v44  ;;  %v1924_v36 = vrot.slane %v1310_v53, %v3995_v9 }
 0x28c   :  { %v1851_v27 = vsel %vm1439_vm7, %v1850_v55, %v1846_v28  ;;  %v1925_v43 = vsel %vm1432_vm6, %v1924_v36, %v1920_v11  ;;  %v4372_v55 = vsub.s32 %v1483_v62, %v3515_v30 }
 0x28d   :  { %v1355_v29 = vpop.permute.xlu1 %1354  ;;  %v1040_v52 = vpop.permute.xlu0 %1039 }
 0x28e   :  { %v1998_v50 = vrot.slane %v1355_v29, %v3992_v6  ;;  %v1473_v10 = vrot.slane %v1040_v52, %v4321_v24 }
 0x290   :  { %v1999_v7 = vsel %vm1425_vm5, %v1998_v50, %v1994_v63  ;;  %v1475_v18 = vsel %vm1474_vm13, %v1473_v10, %v1468_v33  ;;  %vm2058_vm5 = vcmask 1045509  }
 0x291   :  { %v1088_v58 = vpop.permute.xlu1 %1087  ;;  %v1133_v46 = vpop.permute.xlu0 %1132 }
 0x292   :  { %v1559_v41 = vrot.slane %v1088_v58, %v4321_v24  ;;  %v1633_v5 = vrot.slane %v1133_v46, %v4277_v0  ;;  %v1490_v46 = vadd.s32 4294967176, %v3884_v31 }
 0x294   :  { %v1560_v6 = vsel %vm1474_vm13, %v1559_v41, %v1555_v56  ;;  %v1634_v48 = vsel %vm1467_vm12, %v1633_v5, %v1629_v20 }
 0x295   :  { %v1178_v39 = vpop.permute.xlu1 %1177  ;;  %v1223_v40 = vpop.permute.xlu0 %1222 }
 0x296   :  { %v1707_v19 = vrot.slane %v1178_v39, %v4233_v47  ;;  %v1781_v34 = vrot.slane %v1223_v40, %v4170_v35 }
 0x298   :  { %v1708_v16 = vsel %vm1460_vm10, %v1707_v19, %v1703_v37  ;;  %v1782_v21 = vsel %vm1453_vm9, %v1781_v34, %v1777_v17 }
 0x299   :  { %v1268_v2 = vpop.permute.xlu1 %1267  ;;  %v1313_v23 = vpop.permute.xlu0 %1312 }
 0x29a   :  { %v1855_v28 = vrot.slane %v1268_v2, %v4008_v54  ;;  %v1929_v11 = vrot.slane %v1313_v23, %v4001_v44 }
 0x29c   :  { %v1856_v32 = vsel %vm1446_vm8, %v1855_v28, %v1851_v27  ;;  %v1930_v59 = vsel %vm1439_vm7, %v1929_v11, %v1925_v43 }
 0x29d   :  { %v1358_v60 = vpop.permute.xlu1 %1357  ;;  %v1043_v15 = vpop.permute.xlu0 %1042 }
 0x29e   :  { %v2003_v61 = vrot.slane %v1358_v60, %v3995_v9  ;;  %v1480_v63 = vrot.slane %v1043_v15, %v4350_v45 }
 0x2a0   :  { %v2004_v33 = vsel %vm1432_vm6, %v2003_v61, %v1999_v7  ;;  %v1482_v3 = vsel %vm1481_vm14, %v1480_v63, %v1475_v18  ;;  %vm2060_vm6 = vcmask 1046534  }
 0x2a1   :  { %v1091_v25 = vpop.permute.xlu1 %1090  ;;  %v1136_v13 = vpop.permute.xlu0 %1135 }
 0x2a2   :  { %v1564_v51 = vrot.slane %v1091_v25, %v4350_v45  ;;  %v1638_v8 = vrot.slane %v1136_v13, %v4321_v24 }
 0x2a4   :  { %v1565_v56 = vsel %vm1481_vm14, %v1564_v51, %v1560_v6  ;;  %v1639_v20 = vsel %vm1474_vm13, %v1638_v8, %v1634_v48  ;;  %v4392_v6 = vsub.s32 %v1490_v46, %v3515_v30 }
 0x2a5   :  { %v1181_v1 = vpop.permute.xlu1 %1180  ;;  %v1226_v57 = vpop.permute.xlu0 %1225 }
 0x2a6   :  { %v1712_v9 = vrot.slane %v1181_v1, %v4277_v0  ;;  %v1786_v4 = vrot.slane %v1226_v57, %v4233_v47 }
 0x2a8   :  { %v1713_v12 = vsel %vm1467_vm12, %v1712_v9, %v1708_v16  ;;  %v4367_v22 = vsel %vm1460_vm10, %v1786_v4, %v1782_v21 }
 0x2a9   :  { %v1271_v37 = vpop.permute.xlu1 %1270  ;;  %v1316_v17 = vpop.permute.xlu0 %1315 }
 0x2aa   :  { %v1860_v49 = vrot.slane %v1271_v37, %v4170_v35  ;;  %v1934_v53 = vrot.slane %v1316_v17, %v4008_v54 }
 0x2ac   :  { %v4375_v36 = vsel %vm1453_vm9, %v1860_v49, %v1856_v32  ;;  %v4378_v38 = vsel %vm1446_vm8, %v1934_v53, %v1930_v59 }
 0x2ad   :  { %v1361_v27 = vpop.permute.xlu1 %1360  ;;  %v1046_v43 = vpop.permute.xlu0 %1045 }
 0x2ae   :  { %v2008_v29 = vrot.slane %v1361_v27, %v4001_v44  ;;  %v1487_v52 = vrot.slane %v1046_v43, %v4372_v55 }
 0x2b0   :  { %v4383_v50 = vsel %vm1439_vm7, %v2008_v29, %v2004_v33  ;;  %v1489_v10 = vsel %vm1488_vm15, %v1487_v52, %v1482_v3  ;;  %vm2062_vm7 = vcmask 1047559  }
 0x2b1   :  { %v1094_v26 = vpop.permute.xlu1 %1093  ;;  %v1139_v7 = vpop.permute.xlu0 %1138 }
 0x2b2   :  { %v1569_v39 = vrot.slane %v1094_v26, %v4372_v55  ;;  %v1643_v32 = vrot.slane %v1139_v7, %v4350_v45 }
 0x2b4   :  { %v1570_v42 = vsel %vm1488_vm15, %v1569_v39, %v1565_v56  ;;  %v1644_v61 = vsel %vm1481_vm14, %v1643_v32, %v1639_v20 }
 0x2b5   :  { %v1184_v18 = vpop.permute.xlu1 %1183  ;;  %v1229_v58 = vpop.permute.xlu0 %1228 }
 0x2b6   :  { %v1717_v8 = vrot.slane %v1184_v18, %v4321_v24  ;;  %v1791_v52 = vrot.slane %v1229_v58, %v4277_v0 }
 0x2b8   :  { %v1718_v20 = vsel %vm1474_vm13, %v1717_v8, %v1713_v12  ;;  %v1792_v46 = vsel %vm1467_vm12, %v1791_v52, %v4367_v22 }
 0x2b9   :  { %v4387_v41 = vpop.permute.xlu1 %1273  ;;  %v4389_v5 = vpop.permute.xlu0 %1318 }
 0x2ba   :  { %v1939_v22 = vrot.slane %v4389_v5, %v4170_v35 }
 0x2bc   :  { %v1940_v5 = vsel %vm1453_vm9, %v1939_v22, %v4378_v38 }
 0x2bd   :  { %v4394_v44 = vpop.permute.xlu1 %1363  ;;  %v1049_v48 = vpop.permute.xlu0 %1048 }
 0x2be   :  { %v1494_v40 = vrot.slane %v1049_v48, %v4392_v6 }
 0x2c0   :  { %v1496_v16 = vsel %vm1495_vm0, %v1494_v40, %v1489_v10 }
 0x2c1   :  { %v1097_v19 = vpop.permute.xlu1 %1096  ;;  %v1142_v34 = vpop.permute.xlu0 %1141 }
 0x2c2   :  { %v1574_v31 = vrot.slane %v1097_v19, %v4392_v6  ;;  %v1648_v59 = vrot.slane %v1142_v34, %v4372_v55  ;;  %v1865_v34 = vrot.slane %v4387_v41, %v4233_v47 }
 0x2c4   :  { %v1575_v30 = vsel %vm1495_vm0, %v1574_v31, %v1570_v42  ;;  %v1649_v33 = vsel %vm1488_vm15, %v1648_v59, %v1644_v61  ;;  %v1866_v59 = vsel %vm1460_vm10, %v1865_v34, %v4375_v36  ;;  %v2013_v36 = vrot.slane %v4394_v44, %v4008_v54  ;;  %v2696_v34 = vld [vmem:[%s4589_s6 + $0x20] sm:$0xff]  }
 0x2c5   :  { %v2051_v21 = vsel %vm2050_vm1, %v1575_v30, %v1496_v16  ;;  %v1187_v2 = vpop.permute.xlu1 %1186  ;;  %v1232_v23 = vpop.permute.xlu0 %1231 }
 0x2c6   :  { %v1722_v57 = vrot.slane %v1187_v2, %v4350_v45  ;;  %v1796_v10 = vrot.slane %v1232_v23, %v4321_v24 }
 0x2c8   :  { %v1723_v37 = vsel %vm1481_vm14, %v1722_v57, %v1718_v20  ;;  %v1797_v48 = vsel %vm1474_vm13, %v1796_v10, %v1792_v46 }
 0x2c9   :  { %v1277_v28 = vpop.permute.xlu1 %1276  ;;  %v4402_v11 = vpop.permute.xlu0 %1321 }
 0x2ca   :  { %v1870_v42 = vrot.slane %v1277_v28, %v4277_v0  ;;  %v1944_v41 = vrot.slane %v4402_v11, %v4233_v47 }
 0x2cc   :  { %v1945_v8 = vsel %vm1460_vm10, %v1944_v41, %v1940_v5  ;;  %v2698_v41 = vld [vmem:[%s4589_s6 + $0x30] sm:$0xff]  }
 0x2cd   :  { %v4406_v60 = vpop.permute.xlu1 %1366  ;;  %v1145_v15 = vpop.permute.xlu0 %1144  ;;  %v2702_v5 = vld [vmem:[%s4591_s8 + $0x10] sm:$0xff]  }
 0x2ce   :  { %v1653_v63 = vrot.slane %v1145_v15, %v4392_v6  ;;  %v1871_v15 = vsel %vm1467_vm12, %v1870_v42, %v1866_v59  ;;  %v2018_v38 = vrot.slane %v4406_v60, %v4170_v35  ;;  %v2014_v35 = vsel %vm1446_vm8, %v2013_v36, %v4383_v50  ;;  %v2516_v42 = vld [vmem:[%s4586_s3] ss:$0 sm:$0xff] }
 0x2d0   :  { %v1654_v3 = vsel %vm1495_vm0, %v1653_v63, %v1649_v33 }
 0x2d1   :  { %v2053_v25 = vsel %vm2052_vm2, %v1654_v3, %v2051_v21  ;;  %v1190_v13 = vpop.permute.xlu1 %1189  ;;  %v1235_v51 = vpop.permute.xlu0 %1234 }
 0x2d2   :  { %v1727_v9 = vrot.slane %v1190_v13, %v4372_v55  ;;  %v1801_v7 = vrot.slane %v1235_v51, %v4350_v45 }
 0x2d4   :  { %v1728_v49 = vsel %vm1488_vm15, %v1727_v9, %v1723_v37  ;;  %v1802_v19 = vsel %vm1481_vm14, %v1801_v7, %v1797_v48 }
 0x2d5   :  { %v1280_v56 = vpop.permute.xlu1 %1279  ;;  %v1325_v1 = vpop.permute.xlu0 %1324 }
 0x2d6   :  { %v1875_v30 = vrot.slane %v1280_v56, %v4321_v24  ;;  %v1949_v61 = vrot.slane %v1325_v1, %v4277_v0 }
 0x2d8   :  { %v1876_v63 = vsel %vm1474_vm13, %v1875_v30, %v1871_v15  ;;  %v1950_v57 = vsel %vm1467_vm12, %v1949_v61, %v1945_v8  ;;  %v2700_v15 = vld [vmem:[%s4591_s8] sm:$0xff]   ;;  %v2701_v61 = vld [vmem:[%s4591_s8 + $0x8] sm:$0xff]  }
 0x2d9   :  { %v4416_v4 = vpop.permute.xlu1 %1369  ;;  %v1193_v62 = vpop.permute.xlu0 %1192 }
 0x2da   :  { %v1732_v17 = vrot.slane %v1193_v62, %v4392_v6  ;;  %v2023_v54 = vrot.slane %v4416_v4, %v4233_v47  ;;  %v2019_v4 = vsel %vm1453_vm9, %v2018_v38, %v2014_v35 }
 0x2dc   :  { %v1733_v53 = vsel %vm1495_vm0, %v1732_v17, %v1728_v49 }
 0x2dd   :  { %v2055_v27 = vsel %vm2054_vm3, %v1733_v53, %v2053_v25  ;;  %v1238_v43 = vpop.permute.xlu1 %1237  ;;  %v1283_v29 = vpop.permute.xlu0 %1282 }
 0x2de   :  { %v1806_v18 = vrot.slane %v1238_v43, %v4372_v55  ;;  %v1880_v32 = vrot.slane %v1283_v29, %v4350_v45 }
 0x2e0   :  { %v1807_v31 = vsel %vm1488_vm15, %v1806_v18, %v1802_v19  ;;  %v1881_v11 = vsel %vm1481_vm14, %v1880_v32, %v1876_v63  ;;  %v2694_v19 = vld [vmem:[%s4589_s6 + $0x10] sm:$0xff]   ;;  %v2703_v63 = vld [vmem:[%s4591_s8 + $0x18] sm:$0xff]  }
 0x2e1   :  { %v1328_v12 = vpop.permute.xlu1 %1327  ;;  %v1373_v26 = vpop.permute.xlu0 %1372 }
 0x2e2   :  { %v1954_v33 = vrot.slane %v1328_v12, %v4321_v24  ;;  %v2028_v20 = vrot.slane %v1373_v26, %v4277_v0 }
 0x2e4   :  { %v1955_v9 = vsel %vm1474_vm13, %v1954_v33, %v1950_v57  ;;  %v2704_v33 = vld [vmem:[%s4591_s8 + $0x20] sm:$0xff]   ;;  %v2706_v57 = vld [vmem:[%s4591_s8 + $0x30] sm:$0xff]  }
 0x2e5   :  { %v1241_v39 = vpop.permute.xlu1 %1240  ;;  %v1286_v40 = vpop.permute.xlu0 %1285 }
 0x2e6   :  { %v1811_v58 = vrot.slane %v1241_v39, %v4392_v6  ;;  %v1885_v28 = vrot.slane %v1286_v40, %v4372_v55  ;;  %v2690_v39 = vld [vmem:[%s4587_s4 + $0x30] sm:$0xff]   ;;  %v2693_v40 = vld [vmem:[%s4589_s6 + $0x8] sm:$0xff]  }
 0x2e7   :  { %2621 = vmatpush3.bf16.msra.mxu1 %v2690_v39 }
 0x2e8   :  { %v1812_v16 = vsel %vm1495_vm0, %v1811_v58, %v1807_v31  ;;  %v1886_v56 = vsel %vm1488_vm15, %v1885_v28, %v1881_v11  ;;  %2622 = vmatprep.subr.bf16.mxu1 %v2733_v14  ;;  %v2695_v58 = vld [vmem:[%s4589_s6 + $0x18] sm:$0xff]   ;;  %v2697_v31 = vld [vmem:[%s4589_s6 + $0x28] sm:$0xff]  }
 0x2e9   :  { %v2057_v21 = vsel %vm2056_vm4, %v1812_v16, %v2055_v27  ;;  %v1331_v2 = vpop.permute.xlu1 %1330  ;;  %v1376_v23 = vpop.permute.xlu0 %1375  ;;  %v2024_v27 = vsel %vm1460_vm10, %v2023_v54, %v2019_v4  ;;  %v2699_v28 = vld [vmem:[%s4589_s6 + $0x38] sm:$0xff]  }
 0x2ea   :  { %v1959_v13 = vrot.slane %v1331_v2, %v4350_v45  ;;  %v2033_v49 = vrot.slane %v1376_v23, %v4321_v24  ;;  %v2029_v29 = vsel %vm1467_vm12, %v2028_v20, %v2024_v27  ;;  %v2707_v54 = vld [vmem:[%s4591_s8 + $0x38] sm:$0xff]  }
 0x2ec   :  { %v1960_v60 = vsel %vm1481_vm14, %v1959_v13, %v1955_v9  ;;  %v2034_v12 = vsel %vm1474_vm13, %v2033_v49, %v2029_v29 }
 0x2ed   :  { %v1289_v3 = vpop.permute.xlu1 %1288  ;;  %v1334_v25 = vpop.permute.xlu0 %1333 }
 0x2ee   :  { %v1890_v51 = vrot.slane %v1289_v3, %v4392_v6  ;;  %v1964_v1 = vrot.slane %v1334_v25, %v4372_v55  ;;  %v2705_v3 = vld [vmem:[%s4591_s8 + $0x28] sm:$0xff]   ;;  %v2525_v25 = vld [vmem:[%s4588_s5] ss:$0 sm:$0xff] }
 0x2f0   :  { %v1891_v44 = vsel %vm1495_vm0, %v1890_v51, %v1886_v56  ;;  %v1965_v53 = vsel %vm1488_vm15, %v1964_v1, %v1960_v60 }
 0x2f1   :  { %v2059_v62 = vsel %vm2058_vm5, %v1891_v44, %v2057_v21  ;;  %v1379_v37 = vpop.permute.xlu1 %1378  ;;  %v1337_v17 = vpop.permute.xlu0 %1336  ;;  %v2534_v44 = vld [vmem:[%s4590_s7] ss:$0 sm:$0xff] }
 0x2f2   :  { %v1969_v47 = vrot.slane %v1337_v17, %v4392_v6  ;;  %v2038_v0 = vrot.slane %v1379_v37, %v4350_v45 }
 0x2f4   :  { %v1970_v43 = vsel %vm1495_vm0, %v1969_v47, %v1965_v53  ;;  %v2039_v7 = vsel %vm1481_vm14, %v2038_v0, %v2034_v12  ;;  %v2543_v47 = vld [vmem:[%s4592_s9] ss:$0 sm:$0xff] }
 0x2f5   :  { %v1382_v52 = vpop.permute.xlu1 %1381  ;;  %v1385_v50 = vpop.permute.xlu0 %1384  ;;  %v2061_v10 = vsel %vm2060_vm6, %v1970_v43, %v2059_v62 }
 0x2f6   :  { %v2043_v24 = vrot.slane %v1382_v52, %v4372_v55  ;;  %v2048_v26 = vrot.slane %v1385_v50, %v4392_v6  ;;  %v2691_v55 = vld [vmem:[%s4587_s4 + $0x38] sm:$0xff]   ;;  %v2692_v6 = vld [vmem:[%s4589_s6] sm:$0xff]  }
 0x2f7   :  { %2623 = vmatpush3.bf16.msra.mxu1 %v2691_v55 }
 0x2f8   :  { %v2044_v45 = vsel %vm1488_vm15, %v2043_v24, %v2039_v7  ;;  %2648 = vmatprep.subr.bf16.mxu1 %v2733_v14 }
 0x2f9   :  { %v2049_v18 = vsel %vm1495_vm0, %v2048_v26, %v2044_v45 }
 0x2fa   :  { %v2063_v46 = vsel %vm2062_vm7, %v2049_v18, %v2061_v10 }
 0x2fb   :  { %v2064_v48 = vpack.c.b16 %v2063_v46, %v2063_v46 }
 0x2fd   :  { %2605 = vmatmul.mubr.bf16.vlgmr.msra.gmra.mrb[0].mxu0 %v2064_v48 }
 0x2fe   :  { %2644 = vmatprep.mubr.msk.bf16.mxu0 %vm2734_vm11, %v2733_v14  ;;  %2629 = vmatpush3.bf16.msra.mxu0 %v2692_v6 }
 0x2ff   :  { %2630 = vmatprep.subr.bf16.mxu0 %v2733_v14 }
 0x302   :  { %2631 = vmatpush3.bf16.msra.mxu0 %v2693_v40 }
 0x303   :  { %2632 = vmatprep.subr.bf16.mxu0 %v2733_v14 }
 0x306   :  { %2633 = vmatpush3.bf16.msra.mxu0 %v2694_v19 }
 0x307   :  { %2634 = vmatprep.subr.bf16.mxu0 %v2733_v14 }
 0x30a   :  { %2635 = vmatpush3.bf16.msra.mxu0 %v2695_v58 }
 0x30b   :  { %2636 = vmatprep.subr.bf16.mxu0 %v2733_v14 }
 0x30e   :  { %2637 = vmatpush3.bf16.msra.mxu0 %v2696_v34 }
 0x30f   :  { %2638 = vmatprep.subr.bf16.mxu0 %v2733_v14 }
 0x312   :  { %2639 = vmatpush3.bf16.msra.mxu0 %v2697_v31 }
 0x313   :  { %2640 = vmatprep.subr.bf16.mxu0 %v2733_v14 }
 0x316   :  { %2641 = vmatpush3.bf16.msra.mxu0 %v2698_v41 }
 0x317   :  { %2642 = vmatprep.subr.bf16.mxu0 %v2733_v14 }
 0x31a   :  { %2643 = vmatpush3.bf16.msra.mxu0 %v2699_v28 }
 0x3d0   :  { %v2148_v16 = vpop.f32.mrb[0].mxu0 }
 0x3d1   :  { %v2149_v22 = vadd.f32 %v2516_v42, %v2148_v16  ;;  %v2606_v30 = vpop.f32.mrb[1].mxu0 }
 0x3d2   :  { %v2151_v21 = vpop.f32.mrb[2].mxu0 }
 0x3d3   :  { %vm2154_vm8 = vcmp.gt.f32.partialorder %v2149_v22, 0.0  ;;  %v2155_v2 = vmul.f32 0.01, %v2149_v22  ;;  %v2607_v23 = vpop.f32.mrb[3].mxu0 }
 0x3d5   :  { %v2156_v32 = vsel %vm2154_vm8, %v2149_v22, %v2155_v2 }
 0x3d6   :  { %v2157_v59 = vpack.c.bf16 %v2156_v32, %v2156_v32 }
 0x3d8   :  { %2625 = vmatmul.mubr.bf16.vlgmr.msra.gmra.mrb[0].mxu1 %v2157_v59 }
 0x3d9   :  { %2664 = vmatprep.mubr.msk.bf16.mxu1 %vm2734_vm11, %v2733_v14  ;;  %2649 = vmatpush3.bf16.msra.mxu1 %v2700_v15 }
 0x3da   :  { %2650 = vmatprep.subr.bf16.mxu1 %v2733_v14 }
 0x3dd   :  { %2651 = vmatpush3.bf16.msra.mxu1 %v2701_v61 }
 0x3de   :  { %2652 = vmatprep.subr.bf16.mxu1 %v2733_v14 }
 0x3e1   :  { %2653 = vmatpush3.bf16.msra.mxu1 %v2702_v5 }
 0x3e2   :  { %2654 = vmatprep.subr.bf16.mxu1 %v2733_v14 }
 0x3e5   :  { %2655 = vmatpush3.bf16.msra.mxu1 %v2703_v63 }
 0x3e6   :  { %2656 = vmatprep.subr.bf16.mxu1 %v2733_v14 }
 0x3e9   :  { %2657 = vmatpush3.bf16.msra.mxu1 %v2704_v33 }
 0x3ea   :  { %2658 = vmatprep.subr.bf16.mxu1 %v2733_v14 }
 0x3ed   :  { %2659 = vmatpush3.bf16.msra.mxu1 %v2705_v3 }
 0x3ee   :  { %2660 = vmatprep.subr.bf16.mxu1 %v2733_v14 }
 0x3f1   :  { %2661 = vmatpush3.bf16.msra.mxu1 %v2706_v57 }
 0x3f2   :  { %2662 = vmatprep.subr.bf16.mxu1 %v2733_v14 }
 0x3f5   :  { %2663 = vmatpush3.bf16.msra.mxu1 %v2707_v54 }
 0x4ab   :  { %v2263_v36 = vpop.f32.mrb[0].mxu1 }
 0x4ac   :  { %v2264_v11 = vadd.f32 %v2525_v25, %v2263_v36  ;;  %v2626_v13 = vpop.f32.mrb[1].mxu1 }
 0x4ad   :  { %v2266_v51 = vpop.f32.mrb[2].mxu1 }
 0x4ae   :  { %vm2269_vm9 = vcmp.gt.f32.partialorder %v2264_v11, 0.0  ;;  %v2270_v8 = vmul.f32 0.01, %v2264_v11  ;;  %v2627_v38 = vpop.f32.mrb[3].mxu1 }
 0x4b0   :  { %v2271_v56 = vsel %vm2269_vm9, %v2264_v11, %v2270_v8 }
 0x4b1   :  { %v2272_v1 = vpack.c.bf16 %v2271_v56, %v2271_v56 }
 0x4b3   :  { %2645 = vmatmul.mubr.bf16.vlgmr.msra.gmra.mrb[4].mxu0 %v2272_v1 }
 0x586   :  { %v2378_v9 = vpop.f32.mrb[4].mxu0 }
 0x587   :  { %v2379_v20 = vadd.f32 %v2534_v44, %v2378_v9  ;;  %v2646_v62 = vpop.f32.mrb[5].mxu0 }
 0x588   :  { %v2381_v37 = vpop.f32.mrb[6].mxu0 }
 0x589   :  { %vm2384_vm10 = vcmp.gt.f32.partialorder %v2379_v20, 0.0  ;;  %v2385_v17 = vmul.f32 0.01, %v2379_v20  ;;  %v2647_v35 = vpop.f32.mrb[7].mxu0 }
 0x58b   :  { %v2386_v60 = vsel %vm2384_vm10, %v2379_v20, %v2385_v17 }
 0x58c   :  { %v2387_v49 = vpack.c.bf16 %v2386_v60, %v2386_v60 }
 0x58e   :  { %2665 = vmatmul.mubr.bf16.vlgmr.msra.gmra.mrb[4].mxu1 %v2387_v49 }
 0x661   :  { %v2493_v14 = vpop.f32.mrb[4].mxu1 }
 0x662   :  { %v2494_v4 = vadd.f32 %v2543_v47, %v2493_v14  ;;  %v2666_v53 = vpop.f32.mrb[5].mxu1 }
 0x663   :  { %v2496_v0 = vpop.f32.mrb[6].mxu1 }
 0x664   :  { %2499 = vst [vmem:[#allocation2] sm:$0xff] %v2494_v4  ;;  %v2667_v27 = vpop.f32.mrb[7].mxu1 }
 0x665   :  { %2504 = vsyncadd [#allocation3], 64  ;;  %s2735_s7 = smov [#allocation2]  }
 0x666   :  { %s2505_s8 = sshll.u32 %s2735_s7, 4  ;;  %s2506_s8 = int_to_ptr.vmem [resolvable:$true] %s2505_s8 }
 0x667   :  { %s2708_s28 = scalar_lea.vmem %s2506_s8, 64  ;;  %s2712_s0 = scalar_lea.vmem %s2506_s8, 128 }
 0x668   :  { %p2709_p0 = scmp.ne.s32.totalorder %s2506_s8, %s2708_s28  ;;  %p2713_p1 = scmp.lt.s32.totalorder %s2506_s8, %s2506_s8 }
 0x669   :  { %p2714_p2 = scmp.lt.s32.totalorder %s2712_s0, %s2708_s28 }
 0x66b   :  { %p2715_p3 = por %p2714_p2, %p2713_p1 }
 0x66d   :  { %p2716_p4 = pnand %p2715_p3, %p2709_p0 }
 0x66f   :  { %2719 = shalt.err (!%p2716_p4)
}
 0x670   :  { %s2720_s29 = scalar_lea.hbm %s4593_s10, 64 }
 0x671   :  { %p2721_p5 = scmp.ne.s32.totalorder %s4593_s10, %s2720_s29  ;;  %p2724_p6 = scmp.lt.u32.totalorder %s2720_s29, %s4593_s10 }
 0x673   :  { %p2726_p7 = pnand %p2724_p6, %p2721_p5 }
 0x675   :  { %2729 = shalt.err (!%p2726_p7)
}
 0x676   :  { %s2736_s13 = smov 64   ;;  %s2737_s14 = smov 4  }
 0x677   :  { %2511 = dma.vmem_to_hbm [thread:$0]  %s2506_s8, 64, %s4593_s10, [#allocation3], %s2736_s13, %s2736_s13, %s2737_s14  }
 0x678   :  { %2730 = dma.done.wait [#allocation3], 128  }
 0x679   :  { %2731 = vsyncadd [#allocation3], 4294967168 }
 0x67a   :  { %2515 = vsyncpa [#allocation3], 1 }

</bundles_post_ra>
